<compile_context>
chip_gen: v6e
topology: v6e:2x2x1
jax: 0.10.0
libtpu: 0.0.40
codegen_flags: <defaults>
</compile_context>

<pallas_src>
import functools
import math

import jax
import jax.numpy as jnp
from jax.experimental import pallas as pl
from jax.experimental.pallas import tpu as pltpu


# ------------------------------ in-kernel helpers ------------------------------

def _layernorm(x, gamma, beta, eps):
    # PyTorch LayerNorm: biased variance over last dim.
    mu = jnp.mean(x, axis=-1, keepdims=True)
    var = jnp.mean((x - mu) ** 2, axis=-1, keepdims=True)
    return (x - mu) * jax.lax.rsqrt(var + eps) * gamma + beta


def _gelu_exact(x):
    # nn.GELU() default = exact erf-based GELU.
    return 0.5 * x * (1.0 + jax.lax.erf(x * (1.0 / math.sqrt(2.0))))


# ------------------------------- fused encoder kernel --------------------------

def encoder_kernel(x_ref,
                   ln1_g, ln1_b, wqkv_t, bqkv, wproj_r, bproj,
                   ln2_g, ln2_b, wfc1_t, bfc1, wfc2_t, bfc2,
                   lnf_g, lnf_b,
                   o_ref,
                   x_acc,
                   *, num_heads, eps_block, eps_final):
    d = pl.program_id(1)                       # depth step (weights streamed per d)

    @pl.when(d == 0)
    def _():
        x_acc[...] = x_ref[0].astype(jnp.float32)

    x = x_acc[...]                             # (N, C) running activation, f32
    N, C = x.shape
    H = num_heads
    dh = C // H
    scale = dh ** -0.5

    # ---- attention branch: x = x + proj(MHSA(LN1(x))) ----
    xn = _layernorm(x, ln1_g[0], ln1_b[0], eps_block)
    # fused QKV: one lane-dense (N, C) @ (C, 3C) bf16 matmul, f32 accumulation.
    qkv = jnp.dot(xn.astype(jnp.bfloat16), wqkv_t[0],
                  preferred_element_type=jnp.float32) + bqkv[0]        # (N, 3C)

    # Heads are static lane slices of the fused output; the head merge is fused
    # into the projection by accumulating per-head (N, dh) @ (dh, C) matmuls.
    attn_out = jnp.zeros((N, C), jnp.float32)
    for h in range(H):
        q_h = qkv[:, h * dh:(h + 1) * dh]
        k_h = qkv[:, C + h * dh:C + (h + 1) * dh]
        v_h = qkv[:, 2 * C + h * dh:2 * C + (h + 1) * dh]
        s = jnp.einsum('qd,kd->qk',
                       q_h.astype(jnp.bfloat16), k_h.astype(jnp.bfloat16),
                       preferred_element_type=jnp.float32) * scale     # (N, N)
        s = s - jnp.max(s, axis=-1, keepdims=True)
        p = jnp.exp(s)
        p = p / jnp.sum(p, axis=-1, keepdims=True)      # exact divide (torch parity)
        o_h = jnp.dot(p.astype(jnp.bfloat16), v_h.astype(jnp.bfloat16),
                      preferred_element_type=jnp.float32)               # (N, dh)
        attn_out = attn_out + jnp.dot(o_h.astype(jnp.bfloat16), wproj_r[0, h],
                                      preferred_element_type=jnp.float32)
    x = x + attn_out + bproj[0]

    # ---- MLP branch: x = x + fc2(GELU(fc1(LN2(x)))) ----
    xn2 = _layernorm(x, ln2_g[0], ln2_b[0], eps_block)
    h1 = jnp.dot(xn2.astype(jnp.bfloat16), wfc1_t[0],
                 preferred_element_type=jnp.float32) + bfc1[0]
    h1 = _gelu_exact(h1)
    x = x + jnp.dot(h1.astype(jnp.bfloat16), wfc2_t[0],
                    preferred_element_type=jnp.float32) + bfc2[0]

    x_acc[...] = x

    # ---- final LayerNorm on the last depth step, single output writeback ----
    @pl.when(d == pl.num_programs(1) - 1)
    def _():
        y = _layernorm(x, lnf_g[...], lnf_b[...], eps_final)
        o_ref[0] = y.astype(o_ref.dtype)


# ------------------------------------ wrapper ----------------------------------

_LAYER_KEYS = ("ln1_g", "ln1_b", "wqkv_t", "bqkv", "wproj_r", "bproj",
               "ln2_g", "ln2_b", "wfc1_t", "bfc1", "wfc2_t", "bfc2")
_FINAL_KEYS = ("lnf_g", "lnf_b")


def transformer_encoder(x, params, num_heads, eps_block=1e-6, eps_final=1e-5):
    B, N, C = x.shape
    depth = params["wqkv_t"].shape[0]
    hidden = params["wfc1_t"].shape[-1]

    layer_ws = [params[k] for k in _LAYER_KEYS]
    final_ws = [params[k] for k in _FINAL_KEYS]

    def layer_spec(w):
        # stream one layer's slice per depth step (depth is the trailing grid axis)
        nd = w.ndim
        return pl.BlockSpec((1,) + w.shape[1:],
                            lambda b, d, _nd=nd: (d,) + (0,) * (_nd - 1))

    def const_spec(w):
        nd = w.ndim
        return pl.BlockSpec(w.shape, lambda b, d, _nd=nd: (0,) * _nd)

    kernel = functools.partial(encoder_kernel, num_heads=num_heads,
                               eps_block=eps_block, eps_final=eps_final)

    # VMEM budget: double-buffered single-layer weights + activations + headroom.
    nbytes = lambda a: int(a.size) * a.dtype.itemsize
    layer_bytes = sum(nbytes(w) // depth for w in layer_ws)
    act_bytes = 5 * N * C * 4 + N * (3 * C + hidden) * 4 + 2 * N * N * 4
    vmem_limit = int(min(100 * 2 ** 20, 2 * layer_bytes + act_bytes + (16 * 2 ** 20)))

    flops = 2 * B * depth * N * (4 * C * C + 2 * N * C + 2 * C * hidden)
    transcendentals = B * depth * (num_heads * N * N + N * hidden)
    bytes_accessed = sum(nbytes(w) for w in layer_ws + final_ws) + 2 * B * N * C * 4

    return pl.pallas_call(
        kernel,
        out_shape=jax.ShapeDtypeStruct((B, N, C), x.dtype),
        grid=(B, depth),
        in_specs=[pl.BlockSpec((1, N, C), lambda b, d: (b, 0, 0))]
                 + [layer_spec(w) for w in layer_ws]
                 + [const_spec(w) for w in final_ws],
        out_specs=pl.BlockSpec((1, N, C), lambda b, d: (b, 0, 0)),
        scratch_shapes=[pltpu.VMEM((N, C), jnp.float32)],
        compiler_params=pltpu.CompilerParams(
            dimension_semantics=("parallel", "arbitrary"),
            vmem_limit_bytes=vmem_limit),
        cost_estimate=pl.CostEstimate(flops=flops,
                                      transcendentals=transcendentals,
                                      bytes_accessed=bytes_accessed),
    )(x, *layer_ws, *final_ws)


# ---------------------------------- parameters ---------------------------------

def _trunc_normal(key, shape, std=0.02):
    # matches trunc_normal_(std=0.02): N(0, std) truncated at +/- 2 std.
    return jax.random.truncated_normal(key, -2.0, 2.0, shape, jnp.float32) * std


def init_torch_params(key, dim, mlp_ratio, depth):
    """PyTorch-layout (out_features, in_features) weights for each Block."""
    hidden = int(dim * mlp_ratio)
    blocks = []
    for _ in range(depth):
        key, k1, k2, k3, k4 = jax.random.split(key, 5)
        blocks.append(dict(
            ln1_w=jnp.ones((dim,), jnp.float32), ln1_b=jnp.zeros((dim,), jnp.float32),
            qkv_w=_trunc_normal(k1, (3 * dim, dim)), qkv_b=jnp.zeros((3 * dim,), jnp.float32),
            proj_w=_trunc_normal(k2, (dim, dim)), proj_b=jnp.zeros((dim,), jnp.float32),
            ln2_w=jnp.ones((dim,), jnp.float32), ln2_b=jnp.zeros((dim,), jnp.float32),
            fc1_w=_trunc_normal(k3, (hidden, dim)), fc1_b=jnp.zeros((hidden,), jnp.float32),
            fc2_w=_trunc_normal(k4, (dim, hidden)), fc2_b=jnp.zeros((dim,), jnp.float32),
        ))
    final = dict(lnf_w=jnp.ones((dim,), jnp.float32), lnf_b=jnp.zeros((dim,), jnp.float32))
    return blocks, final


def pack_kernel_params(blocks, final, num_heads):
    """Depth-stacked, matmul-ready (transposed, bf16) kernel parameters."""
    depth = len(blocks)
    dim = blocks[0]["proj_w"].shape[0]
    dh = dim // num_heads
    st = lambda name: jnp.stack([b[name] for b in blocks], axis=0)
    return {
        "ln1_g": st("ln1_w")[:, None, :], "ln1_b": st("ln1_b")[:, None, :],
        # fused QKV weight, pre-transposed so the kernel does x @ W: (D, C, 3C)
        "wqkv_t": jnp.transpose(st("qkv_w"), (0, 2, 1)).astype(jnp.bfloat16),
        "bqkv": st("qkv_b")[:, None, :],
        # proj weight pre-transposed + split by head rows: (D, H, dh, C)
        "wproj_r": jnp.transpose(st("proj_w"), (0, 2, 1))
                     .reshape(depth, num_heads, dh, dim).astype(jnp.bfloat16),
        "bproj": st("proj_b")[:, None, :],
        "ln2_g": st("ln2_w")[:, None, :], "ln2_b": st("ln2_b")[:, None, :],
        "wfc1_t": jnp.transpose(st("fc1_w"), (0, 2, 1)).astype(jnp.bfloat16),  # (D, C, hid)
        "bfc1": st("fc1_b")[:, None, :],
        "wfc2_t": jnp.transpose(st("fc2_w"), (0, 2, 1)).astype(jnp.bfloat16),  # (D, hid, C)
        "bfc2": st("fc2_b")[:, None, :],
        "lnf_g": final["lnf_w"][None, :], "lnf_b": final["lnf_b"][None, :],
    }


# ----------------------------- pure-JAX f32 reference ---------------------------

def encoder_reference(x, blocks, final, num_heads):
    def ln(v, w, b, eps):
        mu = jnp.mean(v, axis=-1, keepdims=True)
        var = jnp.mean((v - mu) ** 2, axis=-1, keepdims=True)
        return (v - mu) / jnp.sqrt(var + eps) * w + b

    B, N, C = x.shape
    H = num_heads
    dh = C // H
    for p in blocks:
        h = ln(x, p["ln1_w"], p["ln1_b"], 1e-6)
        qkv = h @ p["qkv_w"].T + p["qkv_b"]
        qkv = qkv.reshape(B, N, 3, H, dh).transpose(2, 0, 3, 1, 4)
        q, k, v = qkv[0], qkv[1], qkv[2]
        attn = jnp.einsum('bhqd,bhkd->bhqk', q, k) * (dh ** -0.5)
        attn = jax.nn.softmax(attn, axis=-1)
        o = jnp.einsum('bhqk,bhkd->bhqd', attn, v)
        o = o.transpose(0, 2, 1, 3).reshape(B, N, C)
        x = x + (o @ p["proj_w"].T + p["proj_b"])
        h2 = ln(x, p["ln2_w"], p["ln2_b"], 1e-6)
        m = h2 @ p["fc1_w"].T + p["fc1_b"]
        m = 0.5 * m * (1.0 + jax.lax.erf(m / math.sqrt(2.0)))
        x = x + (m @ p["fc2_w"].T + p["fc2_b"])
    return ln(x, final["lnf_w"], final["lnf_b"], 1e-5)


# --------------------------------------- main -----------------------------------

if __name__ == "__main__":
    # Small config consistent with the module: embedding=32, heads=4, mlp_ratio=4, depth=2.
    B, N, C = 2, 8, 32
    NUM_HEADS = 4
    MLP_RATIO = 4.0
    DEPTH = 2

    key = jax.random.PRNGKey(0)
    kx, kp = jax.random.split(key)
    x = jax.random.normal(kx, (B, N, C), jnp.float32)

    blocks, final = init_torch_params(kp, C, MLP_RATIO, DEPTH)
    kparams = pack_kernel_params(blocks, final, NUM_HEADS)

    out = transformer_encoder(x, kparams, num_heads=NUM_HEADS)
    out = jax.block_until_ready(out)

    ref = encoder_reference(x, blocks, final, NUM_HEADS)

    assert out.shape == (B, N, C)
    assert bool(jnp.all(jnp.isfinite(out)))
    assert bool(jnp.allclose(out, ref, atol=2e-2, rtol=2e-2))
    print("KERNEL_OK")
</pallas_src>

<mosaic_0001>
module attributes {stable_mosaic.version = 11 : i64} {
  func.func @encoder_kernel(%arg0: i32, %arg1: i32, %arg2: memref<1x8x32xf32, #tpu.memory_space<vmem>>, %arg3: memref<1x1x32xf32, #tpu.memory_space<vmem>>, %arg4: memref<1x1x32xf32, #tpu.memory_space<vmem>>, %arg5: memref<1x32x96xbf16, #tpu.memory_space<vmem>>, %arg6: memref<1x1x96xf32, #tpu.memory_space<vmem>>, %arg7: memref<1x4x8x32xbf16, #tpu.memory_space<vmem>>, %arg8: memref<1x1x32xf32, #tpu.memory_space<vmem>>, %arg9: memref<1x1x32xf32, #tpu.memory_space<vmem>>, %arg10: memref<1x1x32xf32, #tpu.memory_space<vmem>>, %arg11: memref<1x32x128xbf16, #tpu.memory_space<vmem>>, %arg12: memref<1x1x128xf32, #tpu.memory_space<vmem>>, %arg13: memref<1x128x32xbf16, #tpu.memory_space<vmem>>, %arg14: memref<1x1x32xf32, #tpu.memory_space<vmem>>, %arg15: memref<1x32xf32, #tpu.memory_space<vmem>>, %arg16: memref<1x32xf32, #tpu.memory_space<vmem>>, %arg17: memref<1x8x32xf32, #tpu.memory_space<vmem>>, %arg18: memref<8x32xf32, #tpu.memory_space<vmem>>) attributes {dimension_semantics = [#tpu.dimension_semantics<parallel>, #tpu.dimension_semantics<arbitrary>], iteration_bounds = array<i64: 2, 2>, scalar_prefetch = 0 : i64, scratch_operands = 1 : i64, tpu.core_type = #tpu.core_type<tc>, window_params = [{transform_indices = @transform_0, window_bounds = array<i64: 1, 8, 32>}, {transform_indices = @transform_1, window_bounds = array<i64: 1, 1, 32>}, {transform_indices = @transform_2, window_bounds = array<i64: 1, 1, 32>}, {transform_indices = @transform_3, window_bounds = array<i64: 1, 32, 96>}, {transform_indices = @transform_4, window_bounds = array<i64: 1, 1, 96>}, {transform_indices = @transform_5, window_bounds = array<i64: 1, 4, 8, 32>}, {transform_indices = @transform_6, window_bounds = array<i64: 1, 1, 32>}, {transform_indices = @transform_7, window_bounds = array<i64: 1, 1, 32>}, {transform_indices = @transform_8, window_bounds = array<i64: 1, 1, 32>}, {transform_indices = @transform_9, window_bounds = array<i64: 1, 32, 128>}, {transform_indices = @transform_10, window_bounds = array<i64: 1, 1, 128>}, {transform_indices = @transform_11, window_bounds = array<i64: 1, 128, 32>}, {transform_indices = @transform_12, window_bounds = array<i64: 1, 1, 32>}, {pipeline_mode = #tpu.pipeline_mode<synchronous>, transform_indices = @transform_13, window_bounds = array<i64: 1, 32>}, {pipeline_mode = #tpu.pipeline_mode<synchronous>, transform_indices = @transform_14, window_bounds = array<i64: 1, 32>}, {transform_indices = @transform_15, window_bounds = array<i64: 1, 8, 32>}]} {
    %c0_i32 = arith.constant 0 : i32
    %0 = arith.cmpi eq, %arg1, %c0_i32 : i32
    %1 = arith.extui %0 : i1 to i32
    %c0_i32_0 = arith.constant 0 : i32
    %2 = arith.cmpi ne, %1, %c0_i32_0 : i32
    scf.if %2 {
      %c0_91 = arith.constant 0 : index
      %c0_92 = arith.constant 0 : index
      %c0_93 = arith.constant 0 : index
      %199 = vector.load %arg2[%c0_91, %c0_92, %c0_93] : memref<1x8x32xf32, #tpu.memory_space<vmem>>, vector<1x8x32xf32>
      %200 = vector.shape_cast %199 : vector<1x8x32xf32> to vector<8x32xf32>
      %c0_94 = arith.constant 0 : index
      %c0_95 = arith.constant 0 : index
      %201 = vector.load %arg18[%c0_94, %c0_95] : memref<8x32xf32, #tpu.memory_space<vmem>>, vector<8x32xf32>
      tpu.vector_store %arg18[%c0_94, %c0_95], %200 {strides = array<i32>} : memref<8x32xf32, #tpu.memory_space<vmem>>, vector<8x32xf32>,
    } else {
    }
    %c0 = arith.constant 0 : index
    %c0_1 = arith.constant 0 : index
    %3 = vector.load %arg18[%c0, %c0_1] : memref<8x32xf32, #tpu.memory_space<vmem>>, vector<8x32xf32>
    %c0_2 = arith.constant 0 : index
    %c0_3 = arith.constant 0 : index
    %c0_4 = arith.constant 0 : index
    %4 = vector.load %arg3[%c0_2, %c0_3, %c0_4] : memref<1x1x32xf32, #tpu.memory_space<vmem>>, vector<1x1x32xf32>
    %5 = vector.shape_cast %4 : vector<1x1x32xf32> to vector<1x32xf32>
    %c0_5 = arith.constant 0 : index
    %c0_6 = arith.constant 0 : index
    %c0_7 = arith.constant 0 : index
    %6 = vector.load %arg4[%c0_5, %c0_6, %c0_7] : memref<1x1x32xf32, #tpu.memory_space<vmem>>, vector<1x1x32xf32>
    %7 = vector.shape_cast %6 : vector<1x1x32xf32> to vector<1x32xf32>
    %cst = arith.constant dense<0.000000e+00> : vector<8xf32>
    %8 = vector.multi_reduction <add>, %3, %cst [1] : vector<8x32xf32> to vector<8xf32>
    %9 = vector.shape_cast %8 : vector<8xf32> to vector<8x1xf32>
    %cst_8 = arith.constant 3.200000e+01 : f32
    %10 = vector.broadcast %cst_8 : f32 to vector<8x1xf32>
    %11 = arith.divf %9, %10 : vector<8x1xf32>
    %12 = vector.broadcast %11 : vector<8x1xf32> to vector<8x32xf32>
    %13 = arith.subf %3, %12 : vector<8x32xf32>
    %14 = arith.mulf %13, %13 : vector<8x32xf32>
    %cst_9 = arith.constant dense<0.000000e+00> : vector<8xf32>
    %15 = vector.multi_reduction <add>, %14, %cst_9 [1] : vector<8x32xf32> to vector<8xf32>
    %16 = vector.shape_cast %15 : vector<8xf32> to vector<8x1xf32>
    %cst_10 = arith.constant 3.200000e+01 : f32
    %17 = vector.broadcast %cst_10 : f32 to vector<8x1xf32>
    %18 = arith.divf %16, %17 : vector<8x1xf32>
    %19 = vector.broadcast %11 : vector<8x1xf32> to vector<8x32xf32>
    %20 = arith.subf %3, %19 : vector<8x32xf32>
    %cst_11 = arith.constant 9.99999997E-7 : f32
    %21 = vector.broadcast %cst_11 : f32 to vector<8x1xf32>
    %22 = arith.addf %18, %21 : vector<8x1xf32>
    %23 = math.rsqrt %22 : vector<8x1xf32>
    %24 = vector.broadcast %23 : vector<8x1xf32> to vector<8x32xf32>
    %25 = arith.mulf %20, %24 : vector<8x32xf32>
    %26 = vector.broadcast %5 : vector<1x32xf32> to vector<8x32xf32>
    %27 = arith.mulf %25, %26 : vector<8x32xf32>
    %28 = vector.broadcast %7 : vector<1x32xf32> to vector<8x32xf32>
    %29 = arith.addf %27, %28 : vector<8x32xf32>
    %30 = arith.truncf %29 : vector<8x32xf32> to vector<8x32xbf16>
    %c0_12 = arith.constant 0 : index
    %c0_13 = arith.constant 0 : index
    %c0_14 = arith.constant 0 : index
    %31 = vector.load %arg5[%c0_12, %c0_13, %c0_14] : memref<1x32x96xbf16, #tpu.memory_space<vmem>>, vector<1x32x96xbf16>
    %32 = vector.shape_cast %31 : vector<1x32x96xbf16> to vector<32x96xbf16>
    %cst_15 = arith.constant dense<0.000000e+00> : vector<8x96xf32>
    %33 = tpu.matmul %30, %32, %cst_15 {dimension_numbers = #tpu.dot_dimension_numbers<[1], [0], [0], [1], [0, 0, 1, 1], [], []>} : vector<8x32xbf16>, vector<32x96xbf16>, vector<8x96xf32> -> vector<8x96xf32>
    %c0_16 = arith.constant 0 : index
    %c0_17 = arith.constant 0 : index
    %c0_18 = arith.constant 0 : index
    %34 = vector.load %arg6[%c0_16, %c0_17, %c0_18] : memref<1x1x96xf32, #tpu.memory_space<vmem>>, vector<1x1x96xf32>
    %35 = vector.shape_cast %34 : vector<1x1x96xf32> to vector<1x96xf32>
    %36 = vector.broadcast %35 : vector<1x96xf32> to vector<8x96xf32>
    %37 = arith.addf %33, %36 : vector<8x96xf32>
    %cst_19 = arith.constant 0.000000e+00 : f32
    %38 = vector.broadcast %cst_19 : f32 to vector<8x32xf32>
    %39 = vector.extract_strided_slice %37 {offsets = [0, 0], sizes = [8, 8], strides = [1, 1]} : vector<8x96xf32> to vector<8x8xf32>
    %40 = vector.extract_strided_slice %37 {offsets = [0, 32], sizes = [8, 8], strides = [1, 1]} : vector<8x96xf32> to vector<8x8xf32>
    %41 = vector.extract_strided_slice %37 {offsets = [0, 64], sizes = [8, 8], strides = [1, 1]} : vector<8x96xf32> to vector<8x8xf32>
    %42 = arith.truncf %39 : vector<8x8xf32> to vector<8x8xbf16>
    %43 = arith.truncf %40 : vector<8x8xf32> to vector<8x8xbf16>
    "tpu.trace_start"() <{level = 10 : i32, message = "qd,kd->qk"}> : () -> ()
    %cst_20 = arith.constant dense<0.000000e+00> : vector<8x8xf32>
    %44 = tpu.matmul %42, %43, %cst_20 {dimension_numbers = #tpu.dot_dimension_numbers<[1], [1], [0], [0], [0, 0, 1, 0], [], []>} : vector<8x8xbf16>, vector<8x8xbf16>, vector<8x8xf32> -> vector<8x8xf32>
    "tpu.trace_stop"() : () -> ()
    %cst_21 = arith.constant 0.353553385 : f32
    %45 = vector.broadcast %cst_21 : f32 to vector<8x8xf32>
    %46 = arith.mulf %44, %45 : vector<8x8xf32>
    %cst_22 = arith.constant dense<0xFF800000> : vector<8xf32>
    %47 = vector.multi_reduction <maximumf>, %46, %cst_22 [1] : vector<8x8xf32> to vector<8xf32>
    %48 = vector.shape_cast %47 : vector<8xf32> to vector<8x1xf32>
    %49 = vector.broadcast %48 : vector<8x1xf32> to vector<8x8xf32>
    %50 = arith.subf %46, %49 : vector<8x8xf32>
    %51 = math.exp %50 : vector<8x8xf32>
    %cst_23 = arith.constant dense<0.000000e+00> : vector<8xf32>
    %52 = vector.multi_reduction <add>, %51, %cst_23 [1] : vector<8x8xf32> to vector<8xf32>
    %53 = vector.shape_cast %52 : vector<8xf32> to vector<8x1xf32>
    %54 = vector.broadcast %53 : vector<8x1xf32> to vector<8x8xf32>
    %55 = arith.divf %51, %54 : vector<8x8xf32>
    %56 = arith.truncf %55 : vector<8x8xf32> to vector<8x8xbf16>
    %57 = arith.truncf %41 : vector<8x8xf32> to vector<8x8xbf16>
    %cst_24 = arith.constant dense<0.000000e+00> : vector<8x8xf32>
    %58 = tpu.matmul %56, %57, %cst_24 {dimension_numbers = #tpu.dot_dimension_numbers<[1], [0], [0], [1], [0, 0, 1, 1], [], []>} : vector<8x8xbf16>, vector<8x8xbf16>, vector<8x8xf32> -> vector<8x8xf32>
    %59 = arith.truncf %58 : vector<8x8xf32> to vector<8x8xbf16>
    %c0_25 = arith.constant 0 : index
    %c0_26 = arith.constant 0 : index
    %c0_27 = arith.constant 0 : index
    %c0_28 = arith.constant 0 : index
    %60 = vector.load %arg7[%c0_25, %c0_26, %c0_27, %c0_28] : memref<1x4x8x32xbf16, #tpu.memory_space<vmem>>, vector<1x1x8x32xbf16>
    %61 = vector.shape_cast %60 : vector<1x1x8x32xbf16> to vector<8x32xbf16>
    %cst_29 = arith.constant dense<0.000000e+00> : vector<8x32xf32>
    %62 = tpu.matmul %59, %61, %cst_29 {dimension_numbers = #tpu.dot_dimension_numbers<[1], [0], [0], [1], [0, 0, 1, 1], [], []>} : vector<8x8xbf16>, vector<8x32xbf16>, vector<8x32xf32> -> vector<8x32xf32>
    %63 = arith.addf %38, %62 : vector<8x32xf32>
    %64 = vector.extract_strided_slice %37 {offsets = [0, 8], sizes = [8, 8], strides = [1, 1]} : vector<8x96xf32> to vector<8x8xf32>
    %65 = vector.extract_strided_slice %37 {offsets = [0, 40], sizes = [8, 8], strides = [1, 1]} : vector<8x96xf32> to vector<8x8xf32>
    %66 = vector.extract_strided_slice %37 {offsets = [0, 72], sizes = [8, 8], strides = [1, 1]} : vector<8x96xf32> to vector<8x8xf32>
    %67 = arith.truncf %64 : vector<8x8xf32> to vector<8x8xbf16>
    %68 = arith.truncf %65 : vector<8x8xf32> to vector<8x8xbf16>
    "tpu.trace_start"() <{level = 10 : i32, message = "qd,kd->qk"}> : () -> ()
    %cst_30 = arith.constant dense<0.000000e+00> : vector<8x8xf32>
    %69 = tpu.matmul %67, %68, %cst_30 {dimension_numbers = #tpu.dot_dimension_numbers<[1], [1], [0], [0], [0, 0, 1, 0], [], []>} : vector<8x8xbf16>, vector<8x8xbf16>, vector<8x8xf32> -> vector<8x8xf32>
    "tpu.trace_stop"() : () -> ()
    %cst_31 = arith.constant 0.353553385 : f32
    %70 = vector.broadcast %cst_31 : f32 to vector<8x8xf32>
    %71 = arith.mulf %69, %70 : vector<8x8xf32>
    %cst_32 = arith.constant dense<0xFF800000> : vector<8xf32>
    %72 = vector.multi_reduction <maximumf>, %71, %cst_32 [1] : vector<8x8xf32> to vector<8xf32>
    %73 = vector.shape_cast %72 : vector<8xf32> to vector<8x1xf32>
    %74 = vector.broadcast %73 : vector<8x1xf32> to vector<8x8xf32>
    %75 = arith.subf %71, %74 : vector<8x8xf32>
    %76 = math.exp %75 : vector<8x8xf32>
    %cst_33 = arith.constant dense<0.000000e+00> : vector<8xf32>
    %77 = vector.multi_reduction <add>, %76, %cst_33 [1] : vector<8x8xf32> to vector<8xf32>
    %78 = vector.shape_cast %77 : vector<8xf32> to vector<8x1xf32>
    %79 = vector.broadcast %78 : vector<8x1xf32> to vector<8x8xf32>
    %80 = arith.divf %76, %79 : vector<8x8xf32>
    %81 = arith.truncf %80 : vector<8x8xf32> to vector<8x8xbf16>
    %82 = arith.truncf %66 : vector<8x8xf32> to vector<8x8xbf16>
    %cst_34 = arith.constant dense<0.000000e+00> : vector<8x8xf32>
    %83 = tpu.matmul %81, %82, %cst_34 {dimension_numbers = #tpu.dot_dimension_numbers<[1], [0], [0], [1], [0, 0, 1, 1], [], []>} : vector<8x8xbf16>, vector<8x8xbf16>, vector<8x8xf32> -> vector<8x8xf32>
    %84 = arith.truncf %83 : vector<8x8xf32> to vector<8x8xbf16>
    %c0_35 = arith.constant 0 : index
    %c1 = arith.constant 1 : index
    %c0_36 = arith.constant 0 : index
    %c0_37 = arith.constant 0 : index
    %85 = vector.load %arg7[%c0_35, %c1, %c0_36, %c0_37] : memref<1x4x8x32xbf16, #tpu.memory_space<vmem>>, vector<1x1x8x32xbf16>
    %86 = vector.shape_cast %85 : vector<1x1x8x32xbf16> to vector<8x32xbf16>
    %cst_38 = arith.constant dense<0.000000e+00> : vector<8x32xf32>
    %87 = tpu.matmul %84, %86, %cst_38 {dimension_numbers = #tpu.dot_dimension_numbers<[1], [0], [0], [1], [0, 0, 1, 1], [], []>} : vector<8x8xbf16>, vector<8x32xbf16>, vector<8x32xf32> -> vector<8x32xf32>
    %88 = arith.addf %63, %87 : vector<8x32xf32>
    %89 = vector.extract_strided_slice %37 {offsets = [0, 16], sizes = [8, 8], strides = [1, 1]} : vector<8x96xf32> to vector<8x8xf32>
    %90 = vector.extract_strided_slice %37 {offsets = [0, 48], sizes = [8, 8], strides = [1, 1]} : vector<8x96xf32> to vector<8x8xf32>
    %91 = vector.extract_strided_slice %37 {offsets = [0, 80], sizes = [8, 8], strides = [1, 1]} : vector<8x96xf32> to vector<8x8xf32>
    %92 = arith.truncf %89 : vector<8x8xf32> to vector<8x8xbf16>
    %93 = arith.truncf %90 : vector<8x8xf32> to vector<8x8xbf16>
    "tpu.trace_start"() <{level = 10 : i32, message = "qd,kd->qk"}> : () -> ()
    %cst_39 = arith.constant dense<0.000000e+00> : vector<8x8xf32>
    %94 = tpu.matmul %92, %93, %cst_39 {dimension_numbers = #tpu.dot_dimension_numbers<[1], [1], [0], [0], [0, 0, 1, 0], [], []>} : vector<8x8xbf16>, vector<8x8xbf16>, vector<8x8xf32> -> vector<8x8xf32>
    "tpu.trace_stop"() : () -> ()
    %cst_40 = arith.constant 0.353553385 : f32
    %95 = vector.broadcast %cst_40 : f32 to vector<8x8xf32>
    %96 = arith.mulf %94, %95 : vector<8x8xf32>
    %cst_41 = arith.constant dense<0xFF800000> : vector<8xf32>
    %97 = vector.multi_reduction <maximumf>, %96, %cst_41 [1] : vector<8x8xf32> to vector<8xf32>
    %98 = vector.shape_cast %97 : vector<8xf32> to vector<8x1xf32>
    %99 = vector.broadcast %98 : vector<8x1xf32> to vector<8x8xf32>
    %100 = arith.subf %96, %99 : vector<8x8xf32>
    %101 = math.exp %100 : vector<8x8xf32>
    %cst_42 = arith.constant dense<0.000000e+00> : vector<8xf32>
    %102 = vector.multi_reduction <add>, %101, %cst_42 [1] : vector<8x8xf32> to vector<8xf32>
    %103 = vector.shape_cast %102 : vector<8xf32> to vector<8x1xf32>
    %104 = vector.broadcast %103 : vector<8x1xf32> to vector<8x8xf32>
    %105 = arith.divf %101, %104 : vector<8x8xf32>
    %106 = arith.truncf %105 : vector<8x8xf32> to vector<8x8xbf16>
    %107 = arith.truncf %91 : vector<8x8xf32> to vector<8x8xbf16>
    %cst_43 = arith.constant dense<0.000000e+00> : vector<8x8xf32>
    %108 = tpu.matmul %106, %107, %cst_43 {dimension_numbers = #tpu.dot_dimension_numbers<[1], [0], [0], [1], [0, 0, 1, 1], [], []>} : vector<8x8xbf16>, vector<8x8xbf16>, vector<8x8xf32> -> vector<8x8xf32>
    %109 = arith.truncf %108 : vector<8x8xf32> to vector<8x8xbf16>
    %c0_44 = arith.constant 0 : index
    %c2 = arith.constant 2 : index
    %c0_45 = arith.constant 0 : index
    %c0_46 = arith.constant 0 : index
    %110 = vector.load %arg7[%c0_44, %c2, %c0_45, %c0_46] : memref<1x4x8x32xbf16, #tpu.memory_space<vmem>>, vector<1x1x8x32xbf16>
    %111 = vector.shape_cast %110 : vector<1x1x8x32xbf16> to vector<8x32xbf16>
    %cst_47 = arith.constant dense<0.000000e+00> : vector<8x32xf32>
    %112 = tpu.matmul %109, %111, %cst_47 {dimension_numbers = #tpu.dot_dimension_numbers<[1], [0], [0], [1], [0, 0, 1, 1], [], []>} : vector<8x8xbf16>, vector<8x32xbf16>, vector<8x32xf32> -> vector<8x32xf32>
    %113 = arith.addf %88, %112 : vector<8x32xf32>
    %114 = vector.extract_strided_slice %37 {offsets = [0, 24], sizes = [8, 8], strides = [1, 1]} : vector<8x96xf32> to vector<8x8xf32>
    %115 = vector.extract_strided_slice %37 {offsets = [0, 56], sizes = [8, 8], strides = [1, 1]} : vector<8x96xf32> to vector<8x8xf32>
    %116 = vector.extract_strided_slice %37 {offsets = [0, 88], sizes = [8, 8], strides = [1, 1]} : vector<8x96xf32> to vector<8x8xf32>
    %117 = arith.truncf %114 : vector<8x8xf32> to vector<8x8xbf16>
    %118 = arith.truncf %115 : vector<8x8xf32> to vector<8x8xbf16>
    "tpu.trace_start"() <{level = 10 : i32, message = "qd,kd->qk"}> : () -> ()
    %cst_48 = arith.constant dense<0.000000e+00> : vector<8x8xf32>
    %119 = tpu.matmul %117, %118, %cst_48 {dimension_numbers = #tpu.dot_dimension_numbers<[1], [1], [0], [0], [0, 0, 1, 0], [], []>} : vector<8x8xbf16>, vector<8x8xbf16>, vector<8x8xf32> -> vector<8x8xf32>
    "tpu.trace_stop"() : () -> ()
    %cst_49 = arith.constant 0.353553385 : f32
    %120 = vector.broadcast %cst_49 : f32 to vector<8x8xf32>
    %121 = arith.mulf %119, %120 : vector<8x8xf32>
    %cst_50 = arith.constant dense<0xFF800000> : vector<8xf32>
    %122 = vector.multi_reduction <maximumf>, %121, %cst_50 [1] : vector<8x8xf32> to vector<8xf32>
    %123 = vector.shape_cast %122 : vector<8xf32> to vector<8x1xf32>
    %124 = vector.broadcast %123 : vector<8x1xf32> to vector<8x8xf32>
    %125 = arith.subf %121, %124 : vector<8x8xf32>
    %126 = math.exp %125 : vector<8x8xf32>
    %cst_51 = arith.constant dense<0.000000e+00> : vector<8xf32>
    %127 = vector.multi_reduction <add>, %126, %cst_51 [1] : vector<8x8xf32> to vector<8xf32>
    %128 = vector.shape_cast %127 : vector<8xf32> to vector<8x1xf32>
    %129 = vector.broadcast %128 : vector<8x1xf32> to vector<8x8xf32>
    %130 = arith.divf %126, %129 : vector<8x8xf32>
    %131 = arith.truncf %130 : vector<8x8xf32> to vector<8x8xbf16>
    %132 = arith.truncf %116 : vector<8x8xf32> to vector<8x8xbf16>
    %cst_52 = arith.constant dense<0.000000e+00> : vector<8x8xf32>
    %133 = tpu.matmul %131, %132, %cst_52 {dimension_numbers = #tpu.dot_dimension_numbers<[1], [0], [0], [1], [0, 0, 1, 1], [], []>} : vector<8x8xbf16>, vector<8x8xbf16>, vector<8x8xf32> -> vector<8x8xf32>
    %134 = arith.truncf %133 : vector<8x8xf32> to vector<8x8xbf16>
    %c0_53 = arith.constant 0 : index
    %c3 = arith.constant 3 : index
    %c0_54 = arith.constant 0 : index
    %c0_55 = arith.constant 0 : index
    %135 = vector.load %arg7[%c0_53, %c3, %c0_54, %c0_55] : memref<1x4x8x32xbf16, #tpu.memory_space<vmem>>, vector<1x1x8x32xbf16>
    %136 = vector.shape_cast %135 : vector<1x1x8x32xbf16> to vector<8x32xbf16>
    %cst_56 = arith.constant dense<0.000000e+00> : vector<8x32xf32>
    %137 = tpu.matmul %134, %136, %cst_56 {dimension_numbers = #tpu.dot_dimension_numbers<[1], [0], [0], [1], [0, 0, 1, 1], [], []>} : vector<8x8xbf16>, vector<8x32xbf16>, vector<8x32xf32> -> vector<8x32xf32>
    %138 = arith.addf %113, %137 : vector<8x32xf32>
    %139 = arith.addf %3, %138 : vector<8x32xf32>
    %c0_57 = arith.constant 0 : index
    %c0_58 = arith.constant 0 : index
    %c0_59 = arith.constant 0 : index
    %140 = vector.load %arg8[%c0_57, %c0_58, %c0_59] : memref<1x1x32xf32, #tpu.memory_space<vmem>>, vector<1x1x32xf32>
    %141 = vector.shape_cast %140 : vector<1x1x32xf32> to vector<1x32xf32>
    %142 = vector.broadcast %141 : vector<1x32xf32> to vector<8x32xf32>
    %143 = arith.addf %139, %142 : vector<8x32xf32>
    %c0_60 = arith.constant 0 : index
    %c0_61 = arith.constant 0 : index
    %c0_62 = arith.constant 0 : index
    %144 = vector.load %arg9[%c0_60, %c0_61, %c0_62] : memref<1x1x32xf32, #tpu.memory_space<vmem>>, vector<1x1x32xf32>
    %145 = vector.shape_cast %144 : vector<1x1x32xf32> to vector<1x32xf32>
    %c0_63 = arith.constant 0 : index
    %c0_64 = arith.constant 0 : index
    %c0_65 = arith.constant 0 : index
    %146 = vector.load %arg10[%c0_63, %c0_64, %c0_65] : memref<1x1x32xf32, #tpu.memory_space<vmem>>, vector<1x1x32xf32>
    %147 = vector.shape_cast %146 : vector<1x1x32xf32> to vector<1x32xf32>
    %cst_66 = arith.constant dense<0.000000e+00> : vector<8xf32>
    %148 = vector.multi_reduction <add>, %143, %cst_66 [1] : vector<8x32xf32> to vector<8xf32>
    %149 = vector.shape_cast %148 : vector<8xf32> to vector<8x1xf32>
    %cst_67 = arith.constant 3.200000e+01 : f32
    %150 = vector.broadcast %cst_67 : f32 to vector<8x1xf32>
    %151 = arith.divf %149, %150 : vector<8x1xf32>
    %152 = vector.broadcast %151 : vector<8x1xf32> to vector<8x32xf32>
    %153 = arith.subf %143, %152 : vector<8x32xf32>
    %154 = arith.mulf %153, %153 : vector<8x32xf32>
    %cst_68 = arith.constant dense<0.000000e+00> : vector<8xf32>
    %155 = vector.multi_reduction <add>, %154, %cst_68 [1] : vector<8x32xf32> to vector<8xf32>
    %156 = vector.shape_cast %155 : vector<8xf32> to vector<8x1xf32>
    %cst_69 = arith.constant 3.200000e+01 : f32
    %157 = vector.broadcast %cst_69 : f32 to vector<8x1xf32>
    %158 = arith.divf %156, %157 : vector<8x1xf32>
    %159 = vector.broadcast %151 : vector<8x1xf32> to vector<8x32xf32>
    %160 = arith.subf %143, %159 : vector<8x32xf32>
    %cst_70 = arith.constant 9.99999997E-7 : f32
    %161 = vector.broadcast %cst_70 : f32 to vector<8x1xf32>
    %162 = arith.addf %158, %161 : vector<8x1xf32>
    %163 = math.rsqrt %162 : vector<8x1xf32>
    %164 = vector.broadcast %163 : vector<8x1xf32> to vector<8x32xf32>
    %165 = arith.mulf %160, %164 : vector<8x32xf32>
    %166 = vector.broadcast %145 : vector<1x32xf32> to vector<8x32xf32>
    %167 = arith.mulf %165, %166 : vector<8x32xf32>
    %168 = vector.broadcast %147 : vector<1x32xf32> to vector<8x32xf32>
    %169 = arith.addf %167, %168 : vector<8x32xf32>
    %170 = arith.truncf %169 : vector<8x32xf32> to vector<8x32xbf16>
    %c0_71 = arith.constant 0 : index
    %c0_72 = arith.constant 0 : index
    %c0_73 = arith.constant 0 : index
    %171 = vector.load %arg11[%c0_71, %c0_72, %c0_73] : memref<1x32x128xbf16, #tpu.memory_space<vmem>>, vector<1x32x128xbf16>
    %172 = vector.shape_cast %171 : vector<1x32x128xbf16> to vector<32x128xbf16>
    %cst_74 = arith.constant dense<0.000000e+00> : vector<8x128xf32>
    %173 = tpu.matmul %170, %172, %cst_74 {dimension_numbers = #tpu.dot_dimension_numbers<[1], [0], [0], [1], [0, 0, 1, 1], [], []>} : vector<8x32xbf16>, vector<32x128xbf16>, vector<8x128xf32> -> vector<8x128xf32>
    %c0_75 = arith.constant 0 : index
    %c0_76 = arith.constant 0 : index
    %c0_77 = arith.constant 0 : index
    %174 = vector.load %arg12[%c0_75, %c0_76, %c0_77] : memref<1x1x128xf32, #tpu.memory_space<vmem>>, vector<1x1x128xf32>
    %175 = vector.shape_cast %174 : vector<1x1x128xf32> to vector<1x128xf32>
    %176 = vector.broadcast %175 : vector<1x128xf32> to vector<8x128xf32>
    %177 = arith.addf %173, %176 : vector<8x128xf32>
    %cst_78 = arith.constant 5.000000e-01 : f32
    %178 = vector.broadcast %cst_78 : f32 to vector<8x128xf32>
    %179 = arith.mulf %178, %177 : vector<8x128xf32>
    %cst_79 = arith.constant 0.707106769 : f32
    %180 = vector.broadcast %cst_79 : f32 to vector<8x128xf32>
    %181 = arith.mulf %177, %180 : vector<8x128xf32>
    %182 = math.erf %181 : vector<8x128xf32>
    %cst_80 = arith.constant 1.000000e+00 : f32
    %183 = vector.broadcast %cst_80 : f32 to vector<8x128xf32>
    %184 = arith.addf %183, %182 : vector<8x128xf32>
    %185 = arith.mulf %179, %184 : vector<8x128xf32>
    %186 = arith.truncf %185 : vector<8x128xf32> to vector<8x128xbf16>
    %c0_81 = arith.constant 0 : index
    %c0_82 = arith.constant 0 : index
    %c0_83 = arith.constant 0 : index
    %187 = vector.load %arg13[%c0_81, %c0_82, %c0_83] : memref<1x128x32xbf16, #tpu.memory_space<vmem>>, vector<1x128x32xbf16>
    %188 = vector.shape_cast %187 : vector<1x128x32xbf16> to vector<128x32xbf16>
    %cst_84 = arith.constant dense<0.000000e+00> : vector<8x32xf32>
    %189 = tpu.matmul %186, %188, %cst_84 {dimension_numbers = #tpu.dot_dimension_numbers<[1], [0], [0], [1], [0, 0, 1, 1], [], []>} : vector<8x128xbf16>, vector<128x32xbf16>, vector<8x32xf32> -> vector<8x32xf32>
    %190 = arith.addf %143, %189 : vector<8x32xf32>
    %c0_85 = arith.constant 0 : index
    %c0_86 = arith.constant 0 : index
    %c0_87 = arith.constant 0 : index
    %191 = vector.load %arg14[%c0_85, %c0_86, %c0_87] : memref<1x1x32xf32, #tpu.memory_space<vmem>>, vector<1x1x32xf32>
    %192 = vector.shape_cast %191 : vector<1x1x32xf32> to vector<1x32xf32>
    %193 = vector.broadcast %192 : vector<1x32xf32> to vector<8x32xf32>
    %194 = arith.addf %190, %193 : vector<8x32xf32>
    %c0_88 = arith.constant 0 : index
    %c0_89 = arith.constant 0 : index
    %195 = vector.load %arg18[%c0_88, %c0_89] : memref<8x32xf32, #tpu.memory_space<vmem>>, vector<8x32xf32>
    tpu.vector_store %arg18[%c0_88, %c0_89], %194 {strides = array<i32>} : memref<8x32xf32, #tpu.memory_space<vmem>>, vector<8x32xf32>,
    %c1_i32 = arith.constant 1 : i32
    %196 = arith.cmpi eq, %arg1, %c1_i32 : i32
    %197 = arith.extui %196 : i1 to i32
    %c0_i32_90 = arith.constant 0 : i32
    %198 = arith.cmpi ne, %197, %c0_i32_90 : i32
    scf.if %198 {
      %c0_91 = arith.constant 0 : index
      %c0_92 = arith.constant 0 : index
      %199 = vector.load %arg15[%c0_91, %c0_92] : memref<1x32xf32, #tpu.memory_space<vmem>>, vector<1x32xf32>
      %c0_93 = arith.constant 0 : index
      %c0_94 = arith.constant 0 : index
      %200 = vector.load %arg16[%c0_93, %c0_94] : memref<1x32xf32, #tpu.memory_space<vmem>>, vector<1x32xf32>
      %cst_95 = arith.constant dense<0.000000e+00> : vector<8xf32>
      %201 = vector.multi_reduction <add>, %194, %cst_95 [1] : vector<8x32xf32> to vector<8xf32>
      %202 = vector.shape_cast %201 : vector<8xf32> to vector<8x1xf32>
      %cst_96 = arith.constant 3.200000e+01 : f32
      %203 = vector.broadcast %cst_96 : f32 to vector<8x1xf32>
      %204 = arith.divf %202, %203 : vector<8x1xf32>
      %205 = vector.broadcast %204 : vector<8x1xf32> to vector<8x32xf32>
      %206 = arith.subf %194, %205 : vector<8x32xf32>
      %207 = arith.mulf %206, %206 : vector<8x32xf32>
      %cst_97 = arith.constant dense<0.000000e+00> : vector<8xf32>
      %208 = vector.multi_reduction <add>, %207, %cst_97 [1] : vector<8x32xf32> to vector<8xf32>
      %209 = vector.shape_cast %208 : vector<8xf32> to vector<8x1xf32>
      %cst_98 = arith.constant 3.200000e+01 : f32
      %210 = vector.broadcast %cst_98 : f32 to vector<8x1xf32>
      %211 = arith.divf %209, %210 : vector<8x1xf32>
      %212 = vector.broadcast %204 : vector<8x1xf32> to vector<8x32xf32>
      %213 = arith.subf %194, %212 : vector<8x32xf32>
      %cst_99 = arith.constant 9.99999974E-6 : f32
      %214 = vector.broadcast %cst_99 : f32 to vector<8x1xf32>
      %215 = arith.addf %211, %214 : vector<8x1xf32>
      %216 = math.rsqrt %215 : vector<8x1xf32>
      %217 = vector.broadcast %216 : vector<8x1xf32> to vector<8x32xf32>
      %218 = arith.mulf %213, %217 : vector<8x32xf32>
      %219 = vector.broadcast %199 : vector<1x32xf32> to vector<8x32xf32>
      %220 = arith.mulf %218, %219 : vector<8x32xf32>
      %221 = vector.broadcast %200 : vector<1x32xf32> to vector<8x32xf32>
      %222 = arith.addf %220, %221 : vector<8x32xf32>
      %c0_100 = arith.constant 0 : index
      %c0_101 = arith.constant 0 : index
      %c0_102 = arith.constant 0 : index
      %223 = vector.load %arg17[%c0_100, %c0_101, %c0_102] : memref<1x8x32xf32, #tpu.memory_space<vmem>>, vector<1x8x32xf32>
      %224 = vector.shape_cast %223 : vector<1x8x32xf32> to vector<8x32xf32>
      %225 = vector.shape_cast %222 : vector<8x32xf32> to vector<1x8x32xf32>
      tpu.vector_store %arg17[%c0_100, %c0_101, %c0_102], %225 {strides = array<i32>} : memref<1x8x32xf32, #tpu.memory_space<vmem>>, vector<1x8x32xf32>,
    } else {
    }
    return
  }
  func.func @transform_0(%arg0: i32, %arg1: i32) -> (i32, i32, i32) {
    %c0_i32 = arith.constant 0 : i32
    %c0_i32_0 = arith.constant 0 : i32
    %c0_i32_1 = arith.constant 0 : i32
    return %arg0, %c0_i32, %c0_i32_0 : i32, i32, i32
  }
  func.func @transform_1(%arg0: i32, %arg1: i32) -> (i32, i32, i32) {
    %c0_i32 = arith.constant 0 : i32
    %c0_i32_0 = arith.constant 0 : i32
    %c0_i32_1 = arith.constant 0 : i32
    return %arg1, %c0_i32, %c0_i32_0 : i32, i32, i32
  }
  func.func @transform_2(%arg0: i32, %arg1: i32) -> (i32, i32, i32) {
    %c0_i32 = arith.constant 0 : i32
    %c0_i32_0 = arith.constant 0 : i32
    %c0_i32_1 = arith.constant 0 : i32
    return %arg1, %c0_i32, %c0_i32_0 : i32, i32, i32
  }
  func.func @transform_3(%arg0: i32, %arg1: i32) -> (i32, i32, i32) {
    %c0_i32 = arith.constant 0 : i32
    %c0_i32_0 = arith.constant 0 : i32
    %c0_i32_1 = arith.constant 0 : i32
    return %arg1, %c0_i32, %c0_i32_0 : i32, i32, i32
  }
  func.func @transform_4(%arg0: i32, %arg1: i32) -> (i32, i32, i32) {
    %c0_i32 = arith.constant 0 : i32
    %c0_i32_0 = arith.constant 0 : i32
    %c0_i32_1 = arith.constant 0 : i32
    return %arg1, %c0_i32, %c0_i32_0 : i32, i32, i32
  }
  func.func @transform_5(%arg0: i32, %arg1: i32) -> (i32, i32, i32, i32) {
    %c0_i32 = arith.constant 0 : i32
    %c0_i32_0 = arith.constant 0 : i32
    %c0_i32_1 = arith.constant 0 : i32
    %c0_i32_2 = arith.constant 0 : i32
    return %arg1, %c0_i32, %c0_i32_0, %c0_i32_1 : i32, i32, i32, i32
  }
  func.func @transform_6(%arg0: i32, %arg1: i32) -> (i32, i32, i32) {
    %c0_i32 = arith.constant 0 : i32
    %c0_i32_0 = arith.constant 0 : i32
    %c0_i32_1 = arith.constant 0 : i32
    return %arg1, %c0_i32, %c0_i32_0 : i32, i32, i32
  }
  func.func @transform_7(%arg0: i32, %arg1: i32) -> (i32, i32, i32) {
    %c0_i32 = arith.constant 0 : i32
    %c0_i32_0 = arith.constant 0 : i32
    %c0_i32_1 = arith.constant 0 : i32
    return %arg1, %c0_i32, %c0_i32_0 : i32, i32, i32
  }
  func.func @transform_8(%arg0: i32, %arg1: i32) -> (i32, i32, i32) {
    %c0_i32 = arith.constant 0 : i32
    %c0_i32_0 = arith.constant 0 : i32
    %c0_i32_1 = arith.constant 0 : i32
    return %arg1, %c0_i32, %c0_i32_0 : i32, i32, i32
  }
  func.func @transform_9(%arg0: i32, %arg1: i32) -> (i32, i32, i32) {
    %c0_i32 = arith.constant 0 : i32
    %c0_i32_0 = arith.constant 0 : i32
    %c0_i32_1 = arith.constant 0 : i32
    return %arg1, %c0_i32, %c0_i32_0 : i32, i32, i32
  }
  func.func @transform_10(%arg0: i32, %arg1: i32) -> (i32, i32, i32) {
    %c0_i32 = arith.constant 0 : i32
    %c0_i32_0 = arith.constant 0 : i32
    %c0_i32_1 = arith.constant 0 : i32
    return %arg1, %c0_i32, %c0_i32_0 : i32, i32, i32
  }
  func.func @transform_11(%arg0: i32, %arg1: i32) -> (i32, i32, i32) {
    %c0_i32 = arith.constant 0 : i32
    %c0_i32_0 = arith.constant 0 : i32
    %c0_i32_1 = arith.constant 0 : i32
    return %arg1, %c0_i32, %c0_i32_0 : i32, i32, i32
  }
  func.func @transform_12(%arg0: i32, %arg1: i32) -> (i32, i32, i32) {
    %c0_i32 = arith.constant 0 : i32
    %c0_i32_0 = arith.constant 0 : i32
    %c0_i32_1 = arith.constant 0 : i32
    return %arg1, %c0_i32, %c0_i32_0 : i32, i32, i32
  }
  func.func @transform_13(%arg0: i32, %arg1: i32) -> (i32, i32) {
    %c0_i32 = arith.constant 0 : i32
    %c0_i32_0 = arith.constant 0 : i32
    %c0_i32_1 = arith.constant 0 : i32
    return %c0_i32, %c0_i32_0 : i32, i32
  }
  func.func @transform_14(%arg0: i32, %arg1: i32) -> (i32, i32) {
    %c0_i32 = arith.constant 0 : i32
    %c0_i32_0 = arith.constant 0 : i32
    %c0_i32_1 = arith.constant 0 : i32
    return %c0_i32, %c0_i32_0 : i32, i32
  }
  func.func @transform_15(%arg0: i32, %arg1: i32) -> (i32, i32, i32) {
    %c0_i32 = arith.constant 0 : i32
    %c0_i32_0 = arith.constant 0 : i32
    %c0_i32_1 = arith.constant 0 : i32
    return %arg0, %c0_i32, %c0_i32_0 : i32, i32, i32
  }
}

</mosaic_0001>

<bundles_post_ra>
// kernel: tpu_custom_call.1
= control target key start
LH: loop header
LB: loop body
LE: loop exit
PB: predicated region body
PF: predicated region fallthrough
CT: control target
= control target key end

     0   :  { %s2804_s0 = inlined_call_operand.vmem [shape: f32[2,8,32], index: 0, kind: input, shape index: {}]   ;;  %s2805_s1 = inlined_call_operand.vmem [shape: f32[2,1,32], index: 1, kind: input, shape index: {}]   ;;  %s2806_s2 = inlined_call_operand.vmem [shape: f32[2,1,32], index: 2, kind: input, shape index: {}]   ;;  %s2807_s3 = inlined_call_operand.vmem [shape: bf16[2,32,96], index: 3, kind: input, shape index: {}]   ;;  %s2808_s4 = inlined_call_operand.vmem [shape: f32[2,1,96], index: 4, kind: input, shape index: {}]   ;;  %s2809_s5 = inlined_call_operand.vmem [shape: bf16[2,4,8,32], index: 5, kind: input, shape index: {}]   ;;  %s2810_s6 = inlined_call_operand.vmem [shape: f32[2,1,32], index: 6, kind: input, shape index: {}]   ;;  %s2811_s7 = inlined_call_operand.vmem [shape: f32[2,1,32], index: 7, kind: input, shape index: {}]   ;;  %s2812_s8 = inlined_call_operand.vmem [shape: f32[2,1,32], index: 8, kind: input, shape index: {}]   ;;  %s2813_s9 = inlined_call_operand.vmem [shape: bf16[2,32,128], index: 9, kind: input, shape index: {}]   ;;  %s2814_s10 = inlined_call_operand.vmem [shape: f32[2,1,128], index: 10, kind: input, shape index: {}]   ;;  %s2815_s11 = inlined_call_operand.vmem [shape: bf16[2,128,32], index: 11, kind: input, shape index: {}]   ;;  %s2816_s12 = inlined_call_operand.vmem [shape: f32[2,1,32], index: 12, kind: input, shape index: {}]   ;;  %s2817_s13 = inlined_call_operand.vmem [shape: f32[1,32], index: 13, kind: input, shape index: {}]   ;;  %s2818_s14 = inlined_call_operand.vmem [shape: f32[1,32], index: 14, kind: input, shape index: {}]   ;;  %s2819_s15 = inlined_call_operand.hbm [shape: f32[2,8,32], index: 15, kind: output, shape index: {}]  }
   0x1   :  { %2835 = sst [smem:[#allocation19_spill]] %s2804_s0 }
   0x2   :  { %2836 = sst [smem:[#allocation20_spill]] %s2806_s2 }
   0x3   :  { %2837 = sst [smem:[#allocation21_spill]] %s2807_s3 }
   0x4   :  { %2838 = sst [smem:[#allocation22_spill]] %s2809_s5 }
   0x5   :  { %2839 = sst [smem:[#allocation23_spill]] %s2817_s13 }
   0x6   :  { %2840 = sst [smem:[#allocation24_spill]] %s2818_s14 }
   0x7   :  { %2841 = sst [smem:[#allocation25_spill]] %s2819_s15 }
   0x8   :  { %20 = vsyncpa [#allocation4], 0 }
   0x9   :  { %22 = vsyncpa [#allocation4 + $0x1], 0  ;;  %s2426_s18 = smov 0   ;;  %s2428_s19 = smov 0  }
   0xa   :  { %s2430_s20 = smov 0   ;;  %s2432_s21 = smov 0  }
   0xb   :  { %s2434_s22 = smov 0   ;;  %s2436_s23 = smov 0  }
   0xc   :  { %s2438_s24 = smov 0   ;;  %s2440_s25 = smov 0  }
   0xd LB: > { %2842 = sst [smem:[#allocation6_spill]] %s2302_s18  ;;  %s1907_s26 = sadd.s32 4294967295, %s2330_s25   ;;  %s2330_s25 = sphi %s2440_s25, %s28_s25   ;;  %s2326_s24 = sphi %s2438_s24, %s2886_s24   ;;  %s2322_s23 = sphi %s2436_s23, %s2885_s23   ;;  %s2318_s22 = sphi %s2434_s22, %s2884_s22   ;;  %s2314_s21 = sphi %s2432_s21, %s2883_s21   ;;  %s2310_s20 = sphi %s2430_s20, %s2882_s20   ;;  %s2306_s19 = sphi %s2428_s19, %s2881_s19   ;;  %s2302_s18 = sphi %s2426_s18, %s2880_s18  }
   0xe   : > { %2843 = sst [smem:[#allocation7_spill]] %s2306_s19  ;;  %s1908_s27 = sadd.s32 4294967294, %s2330_s25  }
   0xf   : > { %2844 = sst [smem:[#allocation8_spill]] %s2310_s20  ;;  %s37_s28 = sadd.s32 1, %s2322_s23 }
  0x10   : > { %2845 = sst [smem:[#allocation9_spill]] %s2314_s21  ;;  %p38_p0 = scmp.ge.s32.totalorder %s37_s28, 2 }
  0x11   : > { %2846 = sst [smem:[#allocation10_spill]] %s2318_s22  ;;  %s40_s29 = sadd.s32 1, %s2326_s24 }
  0x12   : > { %2847 = sst [smem:[#allocation11_spill]] %s2322_s23  ;;  %p437_p1 = scmp.ne.s32.totalorder %s2310_s20, %s2306_s19 }
  0x13   : > { %2848 = sst [smem:[#allocation12_spill]] %s2326_s24  ;;  %p438_p2 = scmp.eq.s32.totalorder %s1907_s26, 3 }
  0x14   : > { %2849 = sst [smem:[#allocation13_spill]] %s2330_s25  ;;  %s2888_s28 = smov (%p38_p0, %s37_s28), 0 }
  0x15   : > { %2850 = sst [smem:[#allocation14_spill]] %s2888_s28  ;;  %s2890_s29 = smov (!%p38_p0, %s40_s29), %s2326_s24 }
  0x16   : > { %p2475_p3 = por %p438_p2, %p437_p1  ;;  %p443_p4 = scmp.ne.s32.totalorder %s2306_s19, %s2302_s18 }
  0x17   : > { %p42_p5 = scmp.ge.s32.totalorder %s2890_s29, 2  ;;  %p444_p6 = scmp.eq.s32.totalorder %s1908_s27, 3 }
  0x18   : > { %s2851_s30 = scalar_select %p2475_p3, 1, 0 }
  0x19   : > { %p1911_p7 = scmp.ge.s32.totalorder %s2330_s25, 1  ;;  %p555_p8 = scmp.lt.s32.totalorder %s2330_s25, 5 }
  0x1a   : > { %2852 = sst [smem:[#allocation15_spill]] %s2851_s30  ;;  %s2892_s29 = smov (%p42_p5, %s2890_s29), 0 }
  0x1b   : > { %2853 = sst [smem:[#allocation16_spill]] %s2892_s29  ;;  %p2485_p9 = por %p444_p6, %p443_p4 }
  0x1c   : > { %p556_p10 = pnand %p1911_p7, %p555_p8  ;;  %s424_s17 = ssub.s32 %s2326_s24, %s2892_s29 }
  0x1d   : > { %s2854_s16 = scalar_select %p2485_p9, 1, 0 }
  0x1e   : > { %s427_s26 = sadd.s32 1, %s2310_s20  ;;  %p425_p11 = scmp.eq.s32.totalorder %s424_s17, 0 }
  0x1f   : > { %2855 = sst [smem:[#allocation17_spill]] %s2854_s16  ;;  %559 = sbr.rel (%p556_p10) target bundleno = 4403 (0x1133), region = 80 }
  0x20   : > { %s2493_s28 = scalar_select %p425_p11, %s2310_s20, %s427_s26  }
  0x21   : > { %s2824_s27 = sand.u32 (!%p556_p10), 1, %s2306_s19   ;;  %p646_p12 = scmp.lt.s32.totalorder (!%p556_p10), %s2318_s22, 1 }
  0x22   : > { %2856 = sst [smem:[#allocation18_spill]] %s2493_s28  ;;  %s2499_s23 = sshll.u32 (!%p556_p10), %s2824_s27, 3 }
  0x23   : > { %p650_p13 = scmp.lt.s32.totalorder (!%p556_p10), %s2314_s21, 1  ;;  %s2857_s0 = sld [smem:[#allocation19_spill]] (!%p556_p10) }
  0x24   : > { %s647_s16 = scalar_select %p646_p12, %s2318_s22, 1 }
  0x25   : > { %s2504_s18 = scalar_select %p650_p13, %s2314_s21, 1 }
  0x26   : > { %s1913_s17 = sshll.u32 %s647_s16, 3  ;;  %s2859_s3 = sld [smem:[#allocation21_spill]] }
  0x27   : > { %s1967_s19 = sshll.u32 %s2504_s18, 4  ;;  %s2860_s5 = sld [smem:[#allocation22_spill]] }
  0x28   : > { %s2547_s16 = scalar_lea.vmem %s2813_s9, %s1967_s19  ;;  %s685_s29 = scalar_lea.vmem %s2814_s10, %s2504_s18 }
  0x29   : > { %s649_s27 = scalar_lea.vmem %s2857_s0, %s1913_s17  ;;  %s693_s15 = scalar_lea.vmem %s2816_s12, %s2504_s18 }
  0x2a   : > { %s645_s14 = scalar_lea.vmem [#allocation3], %s2499_s23  ;;  %s2861_s22 = sld [smem:[#allocation9_spill]] }
  0x2c   : > { %s2521_s13 = scalar_lea.vmem %s2859_s3, %s1967_s19  ;;  %s677_s3 = scalar_lea.vmem %s2812_s8, %s2504_s18 }
  0x2d   : > { %s2530_s0 = scalar_lea.vmem %s2860_s5, %s1967_s19  ;;  %s1970_s5 = sshll.u32 %s2504_s18, 6 }
  0x2e   : > { %s2561_s20 = scalar_lea.vmem %s2815_s11, %s1970_s5 }
  0x30   : > { %p1922_p0 = scmp.ne.s32.totalorder %s2861_s22, 0 }
  0x32   : > { %698 = sbr.rel (%p1922_p0) target bundleno = 57 (0x39), region = 84 }
  0x37   : > { %v699_v0 = vld [vmem:[%s649_s27] sm:$0xff]  ;;  %vm700_vm0 = vcmask 261120  }
  0x38   : > { %701 = vst.msk [vmem:[#allocation2] sm:$0xff] %vm700_vm0, %v699_v0 }
  0x39 PF: > { %vm705_vm1 = vcmask 261120   ;;  %v2202_v8 = vld [vmem:[%s2521_s13 + $0x8] sm:$0xff]   ;;  %v2332_v9 = vmov 0.0   ;;  %vm2333_vm2 = vmmov 0   ;;  %v2203_v10 = vld [vmem:[%s2521_s13] sm:$0xff]   ;;  %s2862_s13 = scalar_lea.vmem %s2805_s1, %s2504_s18  ;;  %s2863_s21 = sld [smem:[#allocation20_spill]] }
  0x3a   : > { %2010 = vmatprep.subr.bf16.mxu1 %v2332_v9  ;;  %2014 = vmatprep.mubr.msk.bf16.mxu1 %vm2333_vm2, %v2332_v9  ;;  %v1923_v15 = vld [vmem:[%s2862_s13] ss:$0 sm:$0xff]  ;;  %s2865_s28 = scalar_lea.vmem %s2808_s4, %s2504_s18  ;;  %s2334_s30 = smov 64   ;;  %vm805_vm3 = vcmask 64512   ;;  %vm870_vm4 = vcmask 1043456  }
  0x3b   : > { %2011 = vmatpush3.bf16.msra.mxu1 %v2202_v8  ;;  %2036 = vmatprep.subr.bf16.mxu0 %v2332_v9  ;;  %v1925_v21 = vld [vmem:[%s2865_s28] ss:$0 sm:$0xff]  ;;  %s2335_s25 = smov 96   ;;  %s2336_s22 = smov 88  }
  0x3c   : > { %2012 = vmatprep.subr.bf16.mxu1 %v2332_v9  ;;  %2038 = vmatprep.mubr.msk.bf16.mxu0 %vm2333_vm2, %v2332_v9  ;;  %s2337_s2 = smov 120   ;;  %s2338_s5 = smov 56   ;;  %v915_v8 = vld [vmem:[%s2530_s0] sm:$0xf] }
  0x3d   : > { %s2339_s13 = smov 80   ;;  %s2340_s19 = smov 112  }
  0x3e   : > { %s2341_s27 = smov 48   ;;  %s2344_s17 = smov 40  }
  0x3f   : > { %v2565_v1 = vld [vmem:[#allocation2] sm:$0xff]  ;;  %2013 = vmatpush3.bf16.msra.mxu1 %v2203_v10  ;;  %s2864_s26 = scalar_lea.vmem %s2863_s21, %s2504_s18  ;;  %s2342_s21 = smov 72  }
  0x40   : > { %v706_v2 = vsel %vm705_vm1, %v2565_v1, 0.0  ;;  %2018 = vmatprep.subr.bf16.mxu1 %v2332_v9  ;;  %v1924_v17 = vld [vmem:[%s2864_s26] ss:$0 sm:$0xff]  ;;  %s2343_s26 = smov 104   ;;  %s2866_s28 = scalar_lea.vmem %s2810_s6, %s2504_s18 }
  0x41   : > { %707 = vadd.xlane.f32.xlu0 %v706_v2 }
  0xca   : > { %v708_v3 = vpop.xlane.xlu0 %707 }
  0xcb   : > { %v710_v4 = vmul.f32 0.03125, %v708_v3 }
  0xcd   : > { %v711_v5 = vsub.f32 %v2565_v1, %v710_v4  ;;  %v1933_v4 = vld [vmem:[%s2530_s0 + $0x4] sm:$0xf] }
  0xcf   : > { %v712_v6 = vmul.f32 %v711_v5, %v711_v5 }
  0xd1   : > { %v713_v7 = vsel %vm705_vm1, %v712_v6, 0.0 }
  0xd2   : > { %714 = vadd.xlane.f32.xlu0 %v713_v7 }
 0x15b   : > { %v715_v11 = vpop.xlane.xlu0 %714 }
 0x15c   : > { %v716_v12 = vmul.f32 0.03125, %v715_v11 }
 0x15e   : > { %v717_v13 = vadd.f32 1e-06, %v716_v12  ;;  %v1080_v12 = vsel %vm870_vm4, %v915_v8, 0 }
 0x160   : > { %2214 = vrsqrt.f32 %v717_v13 }
 0x16d   : > { %v2215_v14 = vpop.eup %2214 }
 0x16e   : > { %v719_v16 = vmul.f32 %v2215_v14, %v711_v5  ;;  %v1034_v5 = vsel %vm870_vm4, %v1933_v4, 0 }
 0x170   : > { %v726_v18 = vmul.f32 %v1923_v15, %v719_v16 }
 0x172   : > { %v733_v19 = vadd.f32 %v1924_v17, %v726_v18 }
 0x174   : > { %v734_v20 = vpack.c.bf16 %v733_v19, %v733_v19 }
 0x176   : > { %2015 = vmatmul.mubr.msk.bf16.vlgmr.msra.gmra.mxu1 %vm705_vm1, %v734_v20 }
 0x177   : > { %2020 = vmatprep.mubr.msk.bf16.mxu1 %vm2333_vm2, %v2332_v9 }
 0x236   : > { %v795_v22 = vpop.f32.mrf.mxu1 }
 0x237   : > { %v796_v23 = vadd.f32 %v1925_v21, %v795_v22 }
 0x238   : > { %v2016_v24 = vpop.f32.mrf.mxu1 }
 0x239   : > { %v2599_v25 = vpack.c.bf16 %v796_v23, %v796_v23 }
 0x23a   : > { %v798_v26 = vpop.f32.mrf.mxu1 }
 0x23b   : > { %865 = vrot.lane.b32.xlu0 %v2599_v25, %s2334_s30  ;;  %803 = vrot.lane.b32.xlu1 %v2599_v25, %s2335_s25  ;;  %s2867_s25 = scalar_lea.vmem %s2811_s7, %s2504_s18 }
 0x23c   : > { %v2017_v27 = vpop.f32.mrf.mxu1 }
 0x2ad   : > { %v804_v28 = vpop.permute.xlu1 %803  ;;  %v866_v30 = vpop.permute.xlu0 %865 }
 0x2ae   : > { %v810_v29 = vsel %vm805_vm3, %v804_v28, 0  ;;  %v872_v31 = vsel %vm870_vm4, %v866_v30, 0 }
 0x2af   : > { %2019 = vmatpush3.bf16.xpose.msra.mxu1 %v810_v29 }
 0x2b0   : > { %2024 = vmatprep.subr.bf16.mxu1 %v2332_v9 }
 0x2b6   : > { %2021 = vmatmul.mubr.msk.bf16.vlgmr.msra.gmra.mxu1 %vm805_vm3, %v2599_v25 }
 0x2b7   : > { %2025 = vmatpush3.bf16.msra.mxu1 %v872_v31  ;;  %2026 = vmatprep.mubr.msk.bf16.mxu1 %vm2333_vm2, %v2332_v9 }
 0x2b8   : > { %2030 = vmatprep.subr.bf16.mxu1 %v2332_v9 }
 0x376   : > { %v846_v32 = vpop.f32.mrf.mxu1 }
 0x377   : > { %v852_v33 = vmul.f32 0.35355338, %v846_v32 }
 0x378   : > { %v2022_v34 = vpop.f32.mrf.mxu1 }
 0x379   : > { %v853_v35 = vsel %vm805_vm3, %v852_v33, -inf }
 0x37a   : > { %854 = vmax.xlane.f32.xlu1 %v853_v35  ;;  %v849_v36 = vpop.f32.mrf.mxu1 }
 0x37c   : > { %v2023_v37 = vpop.f32.mrf.mxu1 }
 0x403   : > { %v855_v38 = vpop.xlane.xlu1 %854 }
 0x404   : > { %v856_v39 = vsub.f32 %v852_v33, %v855_v38 }
 0x406   : > { %v857_v40 = vmul.f32 1.442695, %v856_v39 }
 0x408   : > { %2216 = vpow2.f32 %v857_v40 }
 0x415   : > { %v2217_v41 = vpop.eup %2216 }
 0x416   : > { %v859_v42 = vsel %vm805_vm3, %v2217_v41, 0.0 }
 0x417   : > { %860 = vadd.xlane.f32.xlu0 %v859_v42 }
 0x42d   : > { %918 = vrot.lane.b32.xlu0 %v2599_v25, %s2336_s22 }
 0x431   : > { %916 = vrot.lane.b32.xlu0 %v2599_v25, %s2337_s2 }
 0x4a0   : > { %v861_v43 = vpop.xlane.xlu0 %860 }
 0x4a1   : > { %2218 = vrcp.f32 %v861_v43 }
 0x4a4   : > { %v919_v46 = vpop.permute.xlu0 %918 }
 0x4a5   : > { %v924_v48 = vsel %vm805_vm3, %v919_v46, 0 }
 0x4a8   : > { %v917_v49 = vpop.permute.xlu0 %916 }
 0x4ae   : > { %v2219_v44 = vpop.eup %2218 }
 0x4af   : > { %v863_v45 = vmul.f32 %v2219_v44, %v2217_v41 }
 0x4b1   : > { %v864_v47 = vpack.c.bf16 %v863_v45, %v863_v45 }
 0x4b3   : > { %2027 = vmatmul.mubr.msk.bf16.vlgmr.msra.gmra.mxu1 %vm805_vm3, %v864_v47 }
 0x4b4   : > { %2031 = vmatpush3.bf16.xpose.msra.mxu1 %v924_v48  ;;  %2032 = vmatprep.mubr.msk.bf16.mxu1 %vm2333_vm2, %v2332_v9 }
 0x4b5   : > { %2042 = vmatprep.subr.bf16.mxu1 %v2332_v9 }
 0x4bb   : > { %2033 = vmatmul.mubr.msk.bf16.vlgmr.msra.gmra.mxu1 %vm805_vm3, %v917_v49 }
 0x4bc   : > { %2044 = vmatprep.mubr.msk.bf16.mxu1 %vm2333_vm2, %v2332_v9  ;;  %2043 = vmatpush3.bf16.msra.mxu1 %v1034_v5 }
 0x4bd   : > { %2054 = vmatprep.subr.bf16.mxu1 %v2332_v9 }
 0x573   : > { %v908_v50 = vpop.f32.mrf.mxu1 }
 0x574   : > { %v914_v14 = vpack.c.bf16 %v908_v50, %v908_v50 }
 0x575   : > { %v2028_v51 = vpop.f32.mrf.mxu1 }
 0x576   : > { %v1938_v51 = vld [vmem:[%s2530_s0 + $0x8] sm:$0xf] }
 0x577   : > { %v911_v52 = vpop.f32.mrf.mxu1 }
 0x578   : > { %v1240_v52 = vsel %vm870_vm4, %v1938_v51, 0 }
 0x579   : > { %v2029_v53 = vpop.f32.mrf.mxu1 }
 0x57b   : > { %v960_v54 = vpop.f32.mrf.mxu1 }
 0x57c   : > { %v966_v55 = vmul.f32 0.35355338, %v960_v54 }
 0x57d   : > { %v2034_v56 = vpop.f32.mrf.mxu1 }
 0x57e   : > { %v967_v57 = vsel %vm805_vm3, %v966_v55, -inf }
 0x57f   : > { %968 = vmax.xlane.f32.xlu1 %v967_v57  ;;  %v963_v58 = vpop.f32.mrf.mxu1 }
 0x581   : > { %v2035_v59 = vpop.f32.mrf.mxu1 }
 0x590   : > { %979 = vrot.lane.b32.xlu1 %v2599_v25, %s2338_s5 }
 0x594   : > { %1124 = vrot.lane.b32.xlu1 %v2599_v25, %s2339_s13 }
 0x598   : > { %1122 = vrot.lane.b32.xlu1 %v2599_v25, %s2340_s19 }
 0x608   : > { %v969_v60 = vpop.xlane.xlu1 %968 }
 0x609   : > { %v970_v61 = vsub.f32 %v966_v55, %v969_v60 }
 0x60b   : > { %v971_v62 = vmul.f32 1.442695, %v970_v61 }
 0x60c   : > { %v980_v63 = vpop.permute.xlu1 %979 }
 0x60d   : > { %2220 = vpow2.f32 %v971_v62  ;;  %v985_v0 = vsel %vm870_vm4, %v980_v63, 0 }
 0x60e   : > { %2037 = vmatpush3.bf16.msra.mxu0 %v985_v0 }
 0x60f   : > { %2048 = vmatprep.subr.bf16.mxu0 %v2332_v9 }
 0x610   : > { %v1125_v16 = vpop.permute.xlu1 %1124 }
 0x611   : > { %v1130_v20 = vsel %vm805_vm3, %v1125_v16, 0 }
 0x614   : > { %v1123_v24 = vpop.permute.xlu1 %1122 }
 0x61a   : > { %v2221_v2 = vpop.eup %2220 }
 0x61b   : > { %v973_v3 = vsel %vm805_vm3, %v2221_v2, 0.0 }
 0x61c   : > { %974 = vadd.xlane.f32.xlu0 %v973_v3 }
 0x632   : > { %1185 = vrot.lane.b32.xlu0 %v2599_v25, %s2341_s27 }
 0x6a5   : > { %v975_v6 = vpop.xlane.xlu0 %974 }
 0x6a6   : > { %2222 = vrcp.f32 %v975_v6 }
 0x6a9   : > { %v1186_v13 = vpop.permute.xlu0 %1185 }
 0x6aa   : > { %v1191_v15 = vsel %vm870_vm4, %v1186_v13, 0 }
 0x6b3   : > { %v2223_v7 = vpop.eup %2222 }
 0x6b4   : > { %v977_v10 = vmul.f32 %v2223_v7, %v2221_v2 }
 0x6b6   : > { %v978_v11 = vpack.c.bf16 %v977_v10, %v977_v10 }
 0x6b8   : > { %2039 = vmatmul.mubr.msk.bf16.vlgmr.msra.gmra.mxu0 %vm805_vm3, %v978_v11 }
 0x6b9   : > { %2049 = vmatpush3.bf16.msra.mxu0 %v1080_v12  ;;  %2050 = vmatprep.mubr.msk.bf16.mxu0 %vm2333_vm2, %v2332_v9  ;;  %v1942_v12 = vld [vmem:[%s2530_s0 + $0xc] sm:$0xf] }
 0x6ba   : > { %2060 = vmatprep.subr.bf16.mxu0 %v2332_v9  ;;  %v1401_v13 = vsel %vm870_vm4, %v1942_v12, 0 }
 0x6c0   : > { %2051 = vmatmul.mubr.msk.bf16.vlgmr.msra.gmra.mxu0 %vm805_vm3, %v914_v14 }
 0x6c1   : > { %2061 = vmatpush3.bf16.msra.mxu0 %v1191_v15  ;;  %2062 = vmatprep.mubr.msk.bf16.mxu0 %vm2333_vm2, %v2332_v9 }
 0x6c2   : > { %2072 = vmatprep.subr.bf16.mxu0 %v2332_v9 }
 0x778   : > { %v1021_v17 = vpop.f32.mrf.mxu0 }
 0x779   : > { %v1027_v18 = vpack.c.bf16 %v1021_v17, %v1021_v17 }
 0x77a   : > { %v2040_v19 = vpop.f32.mrf.mxu0 }
 0x77b   : > { %2045 = vmatmul.mubr.msk.bf16.vlgmr.msra.gmra.mxu1 %vm805_vm3, %v1027_v18 }
 0x77c   : > { %2055 = vmatpush3.bf16.xpose.msra.mxu1 %v1130_v20  ;;  %v1024_v21 = vpop.f32.mrf.mxu0  ;;  %2056 = vmatprep.mubr.msk.bf16.mxu1 %vm2333_vm2, %v2332_v9 }
 0x77d   : > { %2066 = vmatprep.subr.bf16.mxu1 %v2332_v9 }
 0x77e   : > { %v2041_v22 = vpop.f32.mrf.mxu0 }
 0x780   : > { %v2650_v23 = vpop.f32.mrf.mxu0 }
 0x782   : > { %v2052_v26 = vpop.f32.mrf.mxu0 }
 0x783   : > { %2057 = vmatmul.mubr.msk.bf16.vlgmr.msra.gmra.mxu1 %vm805_vm3, %v1123_v24 }
 0x784   : > { %v1119_v27 = vpop.f32.mrf.mxu0  ;;  %2068 = vmatprep.mubr.msk.bf16.mxu1 %vm2333_vm2, %v2332_v9  ;;  %2067 = vmatpush3.bf16.msra.mxu1 %v1240_v52 }
 0x785   : > { %2078 = vmatprep.subr.bf16.mxu1 %v2332_v9 }
 0x786   : > { %v2053_v28 = vpop.f32.mrf.mxu0 }
 0x787   : > { %v1944_v28 = vld [vmem:[%s2866_s28] ss:$0 sm:$0xff] }
 0x83b   : > { %v2655_v29 = vpop.f32.mrf.mxu1 }
 0x83c   : > { %v1117_v8 = vadd.f32 %v2650_v23, %v2655_v29 }
 0x83d   : > { %v2046_v30 = vpop.f32.mrf.mxu1 }
 0x83f   : > { %v1073_v31 = vpop.f32.mrf.mxu1 }
 0x841   : > { %v2047_v32 = vpop.f32.mrf.mxu1 }
 0x843   : > { %v1166_v33 = vpop.f32.mrf.mxu1 }
 0x844   : > { %v1172_v34 = vmul.f32 0.35355338, %v1166_v33 }
 0x845   : > { %v2058_v35 = vpop.f32.mrf.mxu1 }
 0x846   : > { %v1173_v36 = vsel %vm805_vm3, %v1172_v34, -inf }
 0x847   : > { %1174 = vmax.xlane.f32.xlu1 %v1173_v36  ;;  %v1169_v37 = vpop.f32.mrf.mxu1 }
 0x849   : > { %v2059_v38 = vpop.f32.mrf.mxu1 }
 0x8d0   : > { %v1175_v39 = vpop.xlane.xlu1 %1174 }
 0x8d1   : > { %v1176_v40 = vsub.f32 %v1172_v34, %v1175_v39 }
 0x8d3   : > { %v1177_v41 = vmul.f32 1.442695, %v1176_v40  ;;  %v2204_v40 = vld [vmem:[%s2547_s16 + $0x8] sm:$0xff]  }
 0x8d5   : > { %2224 = vpow2.f32 %v1177_v41  ;;  %v2206_v41 = vld [vmem:[%s2561_s20 + $0x38] sm:$0xff]  }
 0x8e2   : > { %v2225_v42 = vpop.eup %2224 }
 0x8e3   : > { %v1179_v43 = vsel %vm805_vm3, %v2225_v42, 0.0 }
 0x8e4   : > { %1180 = vadd.xlane.f32.xlu0 %v1179_v43 }
 0x8fa   : > { %1285 = vrot.lane.b32.xlu0 %v2599_v25, %s2342_s21 }
 0x8fe   : > { %1283 = vrot.lane.b32.xlu0 %v2599_v25, %s2343_s26 }
 0x96d   : > { %v1181_v44 = vpop.xlane.xlu0 %1180 }
 0x96e   : > { %2226 = vrcp.f32 %v1181_v44 }
 0x971   : > { %v1286_v47 = vpop.permute.xlu0 %1285 }
 0x972   : > { %v1291_v49 = vsel %vm805_vm3, %v1286_v47, 0  ;;  %v1945_v47 = vld [vmem:[%s2867_s25] ss:$0 sm:$0xff] }
 0x975   : > { %v1284_v50 = vpop.permute.xlu0 %1283 }
 0x97b   : > { %v2227_v45 = vpop.eup %2226 }
 0x97c   : > { %v1183_v46 = vmul.f32 %v2227_v45, %v2225_v42  ;;  %v2207_v42 = vld [vmem:[%s2561_s20 + $0x30] sm:$0xff]  }
 0x97e   : > { %v1184_v48 = vpack.c.bf16 %v1183_v46, %v1183_v46 }
 0x980   : > { %2063 = vmatmul.mubr.msk.bf16.vlgmr.msra.gmra.mxu0 %vm805_vm3, %v1184_v48 }
 0x981   : > { %2073 = vmatpush3.bf16.xpose.msra.mxu0 %v1291_v49  ;;  %2074 = vmatprep.mubr.msk.bf16.mxu0 %vm2333_vm2, %v2332_v9  ;;  %v1946_v49 = vld [vmem:[%s677_s3] ss:$0 sm:$0xff] }
 0x982   : > { %2084 = vmatprep.subr.bf16.mxu0 %v2332_v9 }
 0x988   : > { %2075 = vmatmul.mubr.msk.bf16.vlgmr.msra.gmra.mxu0 %vm805_vm3, %v1284_v50 }
 0x989   : > { %2086 = vmatprep.mubr.msk.bf16.mxu0 %vm2333_vm2, %v2332_v9  ;;  %2085 = vmatpush3.bf16.msra.mxu0 %v1401_v13 }
 0x98a   : > { %2098 = vmatprep.subr.bf16.mxu0 %v2332_v9 }
 0xa40   : > { %v1227_v53 = vpop.f32.mrf.mxu0 }
 0xa41   : > { %v1233_v54 = vpack.c.bf16 %v1227_v53, %v1227_v53  ;;  %v2208_v53 = vld [vmem:[%s2561_s20 + $0x28] sm:$0xff]  }
 0xa42   : > { %v2064_v55 = vpop.f32.mrf.mxu0 }
 0xa43   : > { %2069 = vmatmul.mubr.msk.bf16.vlgmr.msra.gmra.mxu1 %vm805_vm3, %v1233_v54  ;;  %v2209_v54 = vld [vmem:[%s2561_s20 + $0x20] sm:$0xff]   ;;  %v2210_v55 = vld [vmem:[%s2561_s20 + $0x18] sm:$0xff]  }
 0xa44   : > { %v1230_v56 = vpop.f32.mrf.mxu0  ;;  %2080 = vmatprep.mubr.msk.bf16.mxu1 %vm2333_vm2, %v2332_v9 }
 0xa45   : > { %v2211_v56 = vld [vmem:[%s2561_s20 + $0x10] sm:$0xff]  }
 0xa46   : > { %v2065_v57 = vpop.f32.mrf.mxu0 }
 0xa47   : > { %v2212_v57 = vld [vmem:[%s2561_s20 + $0x8] sm:$0xff]  }
 0xa48   : > { %v1327_v58 = vpop.f32.mrf.mxu0 }
 0xa49   : > { %v1333_v59 = vmul.f32 0.35355338, %v1327_v58  ;;  %v2213_v58 = vld [vmem:[%s2561_s20] sm:$0xff]  }
 0xa4a   : > { %v2076_v60 = vpop.f32.mrf.mxu0 }
 0xa4b   : > { %v1334_v61 = vsel %vm805_vm3, %v1333_v59, -inf }
 0xa4c   : > { %1335 = vmax.xlane.f32.xlu1 %v1334_v61  ;;  %v1330_v62 = vpop.f32.mrf.mxu0 }
 0xa4e   : > { %v2077_v63 = vpop.f32.mrf.mxu0 }
 0xa5d   : > { %1346 = vrot.lane.b32.xlu1 %v2599_v25, %s2344_s17 }
 0xad5   : > { %v1336_v0 = vpop.xlane.xlu1 %1335 }
 0xad6   : > { %v1337_v2 = vsub.f32 %v1333_v59, %v1336_v0  ;;  %v1947_v59 = vld [vmem:[%s685_s29] ss:$0 sm:$0xff]  ;;  %s2868_s29 = sld [smem:[#allocation9_spill]] }
 0xad8   : > { %v1338_v3 = vmul.f32 1.442695, %v1337_v2 }
 0xad9   : > { %v1347_v4 = vpop.permute.xlu1 %1346 }
 0xada   : > { %2228 = vpow2.f32 %v1338_v3  ;;  %v1352_v5 = vsel %vm870_vm4, %v1347_v4, 0 }
 0xadb   : > { %2079 = vmatpush3.bf16.msra.mxu1 %v1352_v5 }
 0xadc   : > { %2090 = vmatprep.subr.bf16.mxu1 %v2332_v9  ;;  %p1960_p1 = scmp.ne.s32.totalorder %s2868_s29, 1 }
 0xadd   : > { %s2869_s19 = sld [smem:[#allocation23_spill]] (!%p1960_p1) }
 0xade   : > { %s2870_s26 = sld [smem:[#allocation24_spill]] (!%p1960_p1) }
 0xae7   : > { %v2229_v6 = vpop.eup %2228 }
 0xae8   : > { %v1340_v7 = vsel %vm805_vm3, %v2229_v6, 0.0 }
 0xae9   : > { %1341 = vadd.xlane.f32.xlu0 %v1340_v7 }
 0xb03   : > { %v1276_v10 = vpop.f32.mrf.mxu1 }
 0xb04   : > { %v1282_v25 = vadd.f32 %v1276_v10, %v1117_v8  ;;  %v1959_v8 = vld [vmem:[%s693_s15] ss:$0 sm:$0xff] }
 0xb05   : > { %v2070_v11 = vpop.f32.mrf.mxu1 }
 0xb07   : > { %v1279_v14 = vpop.f32.mrf.mxu1 }
 0xb09   : > { %v2071_v15 = vpop.f32.mrf.mxu1 }
 0xb72   : > { %v1342_v16 = vpop.xlane.xlu0 %1341 }
 0xb73   : > { %2230 = vrcp.f32 %v1342_v16 }
 0xb80   : > { %v2231_v17 = vpop.eup %2230 }
 0xb81   : > { %v1344_v18 = vmul.f32 %v2231_v17, %v2229_v6 }
 0xb83   : > { %v1345_v19 = vpack.c.bf16 %v1344_v18, %v1344_v18 }
 0xb85   : > { %2081 = vmatmul.mubr.msk.bf16.vlgmr.msra.gmra.mxu1 %vm805_vm3, %v1345_v19 }
 0xb86   : > { %2094 = vmatprep.mubr.msk.bf16.mxu1 %vm2333_vm2, %v2332_v9  ;;  %2091 = vmatpush3.bf16.msra.mxu1 %v2204_v40 }
 0xb87   : > { %2092 = vmatprep.subr.bf16.mxu1 %v2332_v9 }
 0xc45   : > { %v1388_v20 = vpop.f32.mrf.mxu1 }
 0xc46   : > { %v1394_v21 = vpack.c.bf16 %v1388_v20, %v1388_v20 }
 0xc47   : > { %v2082_v22 = vpop.f32.mrf.mxu1 }
 0xc48   : > { %2087 = vmatmul.mubr.msk.bf16.vlgmr.msra.gmra.mxu0 %vm805_vm3, %v1394_v21 }
 0xc49   : > { %v1391_v23 = vpop.f32.mrf.mxu1  ;;  %2114 = vmatprep.mubr.msk.bf16.mxu0 %vm2333_vm2, %v2332_v9  ;;  %2099 = vmatpush3.bf16.msra.mxu0 %v2206_v41 }
 0xc4a   : > { %2100 = vmatprep.subr.bf16.mxu0 %v2332_v9 }
 0xc4b   : > { %v2083_v24 = vpop.f32.mrf.mxu1 }
 0xc4d   : > { %2101 = vmatpush3.bf16.msra.mxu0 %v2207_v42 }
 0xc4e   : > { %2102 = vmatprep.subr.bf16.mxu0 %v2332_v9 }
 0xc51   : > { %2103 = vmatpush3.bf16.msra.mxu0 %v2208_v53 }
 0xc52   : > { %2104 = vmatprep.subr.bf16.mxu0 %v2332_v9 }
 0xc55   : > { %2105 = vmatpush3.bf16.msra.mxu0 %v2209_v54 }
 0xc56   : > { %2106 = vmatprep.subr.bf16.mxu0 %v2332_v9 }
 0xc59   : > { %2107 = vmatpush3.bf16.msra.mxu0 %v2210_v55 }
 0xc5a   : > { %2108 = vmatprep.subr.bf16.mxu0 %v2332_v9 }
 0xc5d   : > { %2109 = vmatpush3.bf16.msra.mxu0 %v2211_v56 }
 0xc5e   : > { %2110 = vmatprep.subr.bf16.mxu0 %v2332_v9 }
 0xc61   : > { %2111 = vmatpush3.bf16.msra.mxu0 %v2212_v57 }
 0xc62   : > { %2112 = vmatprep.subr.bf16.mxu0 %v2332_v9 }
 0xc65   : > { %2113 = vmatpush3.bf16.msra.mxu0 %v2213_v58 }
 0xd08   : > { %v1437_v26 = vpop.f32.mrf.mxu0 }
 0xd09   : > { %v1443_v27 = vadd.f32 %v1437_v26, %v1282_v25 }
 0xd0a   : > { %v2088_v29 = vpop.f32.mrf.mxu0 }
 0xd0b   : > { %v1444_v30 = vadd.f32 %v1443_v27, %v2565_v1  ;;  %v2205_v1 = vld [vmem:[%s2547_s16] sm:$0xff]  }
 0xd0c   : > { %v1440_v31 = vpop.f32.mrf.mxu0  ;;  %2093 = vmatpush3.bf16.msra.mxu1 %v2205_v1 }
 0xd0d   : > { %v2697_v32 = vadd.f32 %v1944_v28, %v1444_v30 }
 0xd0e   : > { %v2089_v33 = vpop.f32.mrf.mxu0 }
 0xd0f   : > { %v1455_v34 = vsel %vm705_vm1, %v2697_v32, 0.0 }
 0xd10   : > { %1456 = vadd.xlane.f32.xlu1 %v1455_v34 }
 0xd99   : > { %v1457_v35 = vpop.xlane.xlu1 %1456 }
 0xd9a   : > { %v1458_v36 = vmul.f32 0.03125, %v1457_v35 }
 0xd9c   : > { %v1459_v37 = vsub.f32 %v2697_v32, %v1458_v36 }
 0xd9e   : > { %v1460_v38 = vmul.f32 %v1459_v37, %v1459_v37 }
 0xda0   : > { %v1461_v39 = vsel %vm705_vm1, %v1460_v38, 0.0 }
 0xda1   : > { %1462 = vadd.xlane.f32.xlu0 %v1461_v39 }
 0xe2a   : > { %v1463_v43 = vpop.xlane.xlu0 %1462 }
 0xe2b   : > { %v1464_v44 = vmul.f32 0.03125, %v1463_v43 }
 0xe2d   : > { %v1465_v45 = vadd.f32 1e-06, %v1464_v44 }
 0xe2f   : > { %2232 = vrsqrt.f32 %v1465_v45 }
 0xe3c   : > { %v2233_v46 = vpop.eup %2232 }
 0xe3d   : > { %v1467_v48 = vmul.f32 %v2233_v46, %v1459_v37 }
 0xe3f   : > { %v1474_v50 = vmul.f32 %v1945_v47, %v1467_v48 }
 0xe41   : > { %v1481_v51 = vadd.f32 %v1946_v49, %v1474_v50 }
 0xe43   : > { %v1482_v52 = vpack.c.bf16 %v1481_v51, %v1481_v51 }
 0xe45   : > { %2095 = vmatmul.mubr.msk.bf16.vlgmr.msra.gmra.mxu1 %vm705_vm1, %v1482_v52 }
 0xf05   : > { %v1543_v60 = vpop.f32.mrf.mxu1 }
 0xf06   : > { %v1544_v61 = vadd.f32 %v1947_v59, %v1543_v60 }
 0xf07   : > { %v2096_v62 = vpop.f32.mrf.mxu1 }
 0xf08   : > { %v1550_v63 = vmul.f32 0.70710677, %v1544_v61  ;;  %v1549_v4 = vmul.f32 0.5, %v1544_v61 }
 0xf09   : > { %v1546_v0 = vpop.f32.mrf.mxu1 }
 0xf0a   : > { %2234 = verf.f32 %v1550_v63 }
 0xf0b   : > { %v2097_v2 = vpop.f32.mrf.mxu1 }
 0xf17   : > { %v2235_v3 = vpop.eup %2234 }
 0xf18   : > { %v1552_v5 = vadd.f32 1.0, %v2235_v3 }
 0xf1a   : > { %v1553_v6 = vmul.f32 %v1552_v5, %v1549_v4 }
 0xf1c   : > { %v1554_v9 = vpack.c.bf16 %v1553_v6, %v1553_v6 }
 0xf1e   : > { %2115 = vmatmul.mubr.bf16.vlgmr.msra.gmra.mxu0 %v1554_v9 }
 0xfde   : > { %v1653_v7 = vpop.f32.mrf.mxu0 }
 0xfdf   : > { %v1659_v10 = vadd.f32 %v1653_v7, %v2697_v32 }
 0xfe0   : > { %v2116_v25 = vpop.f32.mrf.mxu0  ;;  %1672 = sbr.rel (%p1960_p1) target bundleno = 4378 (0x111a), region = 88 }
 0xfe1   : > { %v1667_v11 = vadd.f32 %v1959_v8, %v1659_v10 }
 0xfe2   : > { %v1656_v12 = vpop.f32.mrf.mxu0 }
 0xfe3   : > { %1668 = vst.msk [vmem:[#allocation2] sm:$0xff] %vm705_vm1, %v1667_v11 }
 0xfe4   : > { %v2117_v13 = vpop.f32.mrf.mxu0 }
 0xfe5   : > { %v1675_v14 = vsel %vm705_vm1, %v1667_v11, 0.0  ;;  %v1961_v24 = vld [vmem:[%s2869_s19] ss:$0 sm:$0xff] }
 0xfe6   : > { %1676 = vadd.xlane.f32.xlu0 %v1675_v14  ;;  %v1962_v27 = vld [vmem:[%s2870_s26] ss:$0 sm:$0xff] }
0x106f   : > { %v1677_v15 = vpop.xlane.xlu0 %1676 }
0x1070   : > { %v1678_v16 = vmul.f32 0.03125, %v1677_v15 }
0x1072   : > { %v1679_v17 = vsub.f32 %v1667_v11, %v1678_v16 }
0x1074   : > { %v1680_v18 = vmul.f32 %v1679_v17, %v1679_v17 }
0x1076   : > { %v1681_v19 = vsel %vm705_vm1, %v1680_v18, 0.0 }
0x1077   : > { %1682 = vadd.xlane.f32.xlu0 %v1681_v19 }
0x1100   : > { %v1683_v20 = vpop.xlane.xlu0 %1682 }
0x1101   : > { %v1684_v21 = vmul.f32 0.03125, %v1683_v20 }
0x1103   : > { %v1685_v22 = vadd.f32 1e-05, %v1684_v21 }
0x1105   : > { %2236 = vrsqrt.f32 %v1685_v22 }
0x1112   : > { %v2237_v23 = vpop.eup %2236 }
0x1113   : > { %v1687_v26 = vmul.f32 %v2237_v23, %v1679_v17 }
0x1115   : > { %v1694_v28 = vmul.f32 %v1961_v24, %v1687_v26 }
0x1117   : > { %v1701_v29 = vadd.f32 %v1962_v27, %v1694_v28 }
0x1119   : > { %1702 = vst.msk [vmem:[%s645_s14] sm:$0xff] %vm705_vm1, %v1701_v29 }
0x111a PF: > { %s2871_s17 = sld [smem:[#allocation10_spill]]  ;;  %s1717_s3 = sshll.u32 %s645_s14, 4  ;;  %s1718_s3 = int_to_ptr.vmem [resolvable:$true] %s1717_s3 }
0x111b   : > { %s2872_s0 = sld [smem:[#allocation7_spill]]  ;;  %s2238_s13 = scalar_lea.vmem %s1718_s3, 128 }
0x111c   : > { %s2874_s25 = sld [smem:[#allocation25_spill]]  ;;  %p2239_p2 = scmp.ne.s32.totalorder %s1718_s3, %s2238_s13 }
0x111d   : > { %s2345_s29 = smov [#allocation3]  }
0x111e   : > { %p2240_p4 = pnand %p2239_p2, %p2475_p3  ;;  %s2242_s18 = sshll.u32 %s2345_s29, 4  ;;  %s2243_s18 = int_to_ptr.vmem [resolvable:$false] %s2242_s18 }
0x111f   : > { %s2244_s15 = scalar_lea.vmem %s2243_s18, 256  ;;  %p2245_p6 = scmp.lt.s32.totalorder %s1718_s3, %s2243_s18 }
0x1120   : > { %s1964_s28 = sshll.u32 %s2871_s17, 7  ;;  %p2241_p5 = pneg %p2240_p4 }
0x1121   : > { %s2876_s5 = sand.u32 1, %s2872_s0   ;;  %p2246_p7 = scmp.lt.s32.totalorder %s2244_s15, %s2238_s13 }
0x1122   : > { %s2875_s2 = smov %s2874_s25  ;;  %s1715_s22 = scalar_lea.hbm %s2874_s25, %s1964_s28 }
0x1123   : > { %s1704_s20 = scalar_lea.sflag [#allocation4], %s2876_s5  ;;  %p2247_p8 = por %p2246_p7, %p2245_p6 }
0x1125   : > { %p2248_p10 = pnand %p2247_p8, %p2241_p5 }
0x1127   : > { %2251 = shalt.err (!%p2248_p10)
}
0x1128   : > { %s2252_s19 = scalar_lea.hbm %s1715_s22, 128  ;;  %s2256_s27 = scalar_lea.hbm %s2875_s2, 256 }
0x1129   : > { %p2253_p11 = scmp.ne.s32.totalorder %s1715_s22, %s2252_s19  ;;  %p2257_p0 = scmp.lt.s32.totalorder %s1715_s22, %s2875_s2 }
0x112a   : > { %p2258_p1 = scmp.lt.s32.totalorder %s2256_s27, %s2252_s19 }
0x112b   : > { %p2254_p12 = pnand %p2253_p11, %p2475_p3 }
0x112c   : > { %p2259_p2 = por %p2258_p1, %p2257_p0 }
0x112d   : > { %p2255_p13 = pneg %p2254_p12 }
0x112f   : > { %p2260_p4 = pnand %p2259_p2, %p2255_p13 }
0x1131   : > { %2263 = shalt.err (!%p2260_p4)
}
0x1132   : > { %2118 = dma.vmem_to_hbm [thread:$0]  (%p2475_p3), %s1718_s3, 128, %s1715_s22, %s1704_s20  }
0x1133 PF: > { %s2877_s17 = sld [smem:[#allocation13_spill]] }
0x1134   : > { %s2878_s0 = sld [smem:[#allocation6_spill]] }
0x1139   : > { %p2124_p5 = scmp.ge.s32.totalorder %s2877_s17, 2 }
0x113a   : > { %s1729_s16 = sand.u32 1, %s2878_s0  }
0x113b   : > { %p2121_p6 = pnand %p2124_p5, %p2485_p9  ;;  %s1730_s30 = scalar_lea.sflag [#allocation4], %s1729_s16 }
0x113d   : > { %p2122_p7 = pneg %p2121_p6 }
0x113f   : > { %2297 = dma.done.wait (%p2122_p7), %s1730_s30, 128  }
0x1140   : > { %2299 = vsyncadd (%p2122_p7), %s1730_s30, 4294967168  ;;  %s28_s25 = sadd.s32 1, %s2877_s17   ;;  %s2880_s18 = sld [smem:[#allocation7_spill]] }
0x1141   : > { %p25_p8 = scmp.ge.s32.totalorder %s28_s25, 6   ;;  %s2881_s19 = sld [smem:[#allocation8_spill]] }
0x1142   : > { %s2882_s20 = sld [smem:[#allocation18_spill]] }
0x1143   : > { %s2883_s21 = sld [smem:[#allocation11_spill]]  ;;  %27 = sbr.rel (!%p25_p8) target bundleno = 13 (0xd), region = 162 }
0x1144   : > { %s2884_s22 = sld [smem:[#allocation12_spill]] }
0x1145   : > { %s2885_s23 = sld [smem:[#allocation14_spill]] }
0x1146   : > { %s2886_s24 = sld [smem:[#allocation16_spill]] }
0x1148   :  { %1735 = vsyncpa [#allocation4], 1 }
0x1149   :  { %1737 = vsyncpa [#allocation4 + $0x1], 1 }

</bundles_post_ra>
